<compile_context>
chip_gen: v7x
topology: tpu7x:2x2x1
jax: 0.10.0
libtpu: 0.0.40
codegen_flags: <defaults>
</compile_context>

<pallas_src>
import numpy as np

import jax
import jax.numpy as jnp
from jax import lax
from jax.experimental import pallas as pl
from jax.experimental.pallas import tpu as pltpu

EPS = 1e-5  # nn.BatchNorm2d default eps


def _round_up(x, m):
    return ((x + m - 1) // m) * m


# ---------------------------------------------------------------------------
# One-time parameter / constant preparation (outside the per-step jit).
# ---------------------------------------------------------------------------

def prepare_inputs(params, height, width):
    """Turn torch-layout DQN params into the fused kernel's operand list."""
    conv_params = params["conv"]
    w1, b1, w2, b2 = params["fc"]

    assert height % 8 == 0 and width % 8 == 0, "DQN assumes H, W divisible by 8"

    ops = []
    flops_per_sample = 0
    H, W = height, width
    for (w_oihw, b, gamma, beta, mean, var) in conv_params:
        cout, cin, kh, kw = w_oihw.shape
        assert (kh, kw) == (3, 3)
        # torch (Cout, Cin, ky, kx) -> (ky, kx, Cin, Cout)
        wk = jnp.transpose(w_oihw, (2, 3, 1, 0))

        # Band matrices: B_ky[(w_in,ci),(w_out,co)] = wk[ky, w_in-w_out+1, ci, co]
        bands = []
        for ky in range(3):
            bk = jnp.zeros((W * cin, W * cout), jnp.float32)
            for kx in range(3):
                d = jnp.asarray(np.eye(W, k=1 - kx, dtype=np.float32))
                bk = bk + jnp.einsum("ab,ij->aibj", d, wk[ky, kx]).reshape(
                    W * cin, W * cout)
            bands.append(bk)
        bands = jnp.stack(bands)                               # (3, W*cin, W*cout)

        # Vertical tap shifts (exact 0/1): row h reads row h-1 / h+1 (zero pad).
        ash = np.stack([np.eye(H, k=-1, dtype=np.float32),     # ky = 0
                        np.eye(H, k=+1, dtype=np.float32)])    # ky = 2

        # MaxPool column selection: (W*cout, (W//2)*cout), picks w = 2q + dc.
        scol = np.zeros((2, W * cout, (W // 2) * cout), np.float32)
        for dc in range(2):
            e = np.zeros((W, W // 2), np.float32)
            e[2 * np.arange(W // 2) + dc, np.arange(W // 2)] = 1.0
            scol[dc] = np.kron(e, np.eye(cout, dtype=np.float32))

        # MaxPool row selection: (H//2, H), picks h = 2p + dr.
        srow = np.zeros((2, H // 2, H), np.float32)
        for dr in range(2):
            srow[dr, np.arange(H // 2), 2 * np.arange(H // 2) + dr] = 1.0

        # BatchNorm2d (eval): y = y * scale + shift, tiled along the (w, c) cols.
        scale = gamma / jnp.sqrt(var + EPS)
        shift = beta - mean * scale
        bias_row = jnp.tile(b, W).reshape(1, W * cout)
        scale_row = jnp.tile(scale, W).reshape(1, W * cout)
        shift_row = jnp.tile(shift, W).reshape(1, W * cout)

        ops += [bands, jnp.asarray(ash), jnp.asarray(scol), jnp.asarray(srow),
                bias_row, scale_row, shift_row]

        flops_per_sample += 2 * (2 * H * H * (W * cin))                     # row shifts
        flops_per_sample += 3 * (2 * H * (W * cin) * (W * cout))            # conv bands
        flops_per_sample += 2 * (2 * H * (W * cout) * ((W // 2) * cout))    # col pool
        flops_per_sample += 2 * (2 * (H // 2) * H * ((W // 2) * cout))      # row pool

        H, W = H // 2, W // 2

    # ------------------------------ FC head ------------------------------ #
    c3 = conv_params[-1][0].shape[0]
    h3, w3 = H, W
    hidden = w1.shape[1]
    out_features = w2.shape[1]
    assert w1.shape[0] == c3 * h3 * w3

    # torch flatten order is (c, h, w); kernel activation cols are (w, c) and
    # rows are h -> per-row weight slabs (pure row permutation of w1).
    w1h = (w1.reshape(c3, h3, w3, hidden)
             .transpose(1, 2, 0, 3)
             .reshape(h3, w3 * c3, hidden))

    outp = _round_up(out_features, 128)        # lane-dense final store
    w2p = jnp.pad(w2, ((0, 0), (0, outp - out_features)))
    b2p = jnp.pad(b2, (0, outp - out_features)).reshape(1, outp)
    ops += [w1h, b1.reshape(1, hidden), w2p, b2p]

    flops_per_sample += h3 * 2 * (w3 * c3) * hidden + 2 * hidden * outp

    meta = dict(h3=h3, out_features=out_features, outp=outp,
                num_conv=len(conv_params), flops_per_sample=flops_per_sample)
    return ops, meta


# ---------------------------------------------------------------------------
# Fused Pallas kernel (one grid step == one sample).
# ---------------------------------------------------------------------------

def _make_kernel(num_conv, h3):
    def kernel(*refs):
        x_ref = refs[0]
        o_ref = refs[-1]
        conv_refs = refs[1:1 + 7 * num_conv]
        w1h_ref, b1_ref, w2_ref, b2_ref = refs[1 + 7 * num_conv:-1]

        x = x_ref[...]                                   # (H, W*Cin), rows=h, cols=(w,c)
        for l in range(num_conv):
            band, ash, scol, srow, brow, scrow, shrow = conv_refs[7 * l:7 * (l + 1)]
            # Conv2d(3x3, padding=1): vertical taps via exact 0/1 row shifts,
            # horizontal taps + channel mixing folded into banded weights.
            y = jnp.dot(x, band[1], preferred_element_type=jnp.float32)
            y = y + jnp.dot(jnp.dot(ash[0], x, preferred_element_type=jnp.float32),
                            band[0], preferred_element_type=jnp.float32)
            y = y + jnp.dot(jnp.dot(ash[1], x, preferred_element_type=jnp.float32),
                            band[2], preferred_element_type=jnp.float32)
            # bias -> ReLU -> BatchNorm2d (eval: y*scale + shift)
            y = jnp.maximum(y + brow[...], 0.0)
            y = y * scrow[...] + shrow[...]
            # MaxPool2d(2,2): exact 0/1 column/row selections + elementwise max.
            yc = jnp.maximum(
                jnp.dot(y, scol[0], preferred_element_type=jnp.float32),
                jnp.dot(y, scol[1], preferred_element_type=jnp.float32))
            x = jnp.maximum(
                jnp.dot(srow[0], yc, preferred_element_type=jnp.float32),
                jnp.dot(srow[1], yc, preferred_element_type=jnp.float32))

        # Flatten (NCHW order baked into w1h) -> Linear -> ReLU
        # TODO(synk): nn.Dropout(0.5) is the identity in eval mode; training-mode
        # RNG masking is not implemented here.
        acc = jnp.dot(x[0:1, :], w1h_ref[0], preferred_element_type=jnp.float32)
        for h in range(1, h3):
            acc = acc + jnp.dot(x[h:h + 1, :], w1h_ref[h],
                                preferred_element_type=jnp.float32)
        h1 = jnp.maximum(acc + b1_ref[...], 0.0)

        # Linear -> ReLU, lane-padded to a multiple of 128 (sliced in wrapper).
        out = jnp.dot(h1, w2_ref[...], preferred_element_type=jnp.float32)
        o_ref[0] = jnp.maximum(out + b2_ref[...], 0.0)

    return kernel


def dqn_forward(state_nchw, ops, meta):
    """Full DQN.forward (inference semantics) as a single fused pallas_call."""
    n, cin, hh, ww = state_nchw.shape
    outp = meta["outp"]
    num_conv = meta["num_conv"]
    h3 = meta["h3"]

    # NCHW -> per-sample 2-D layout: rows = (n, h), cols = (w, c).
    x2d = jnp.transpose(state_nchw, (0, 2, 3, 1)).reshape(n * hh, ww * cin)

    kernel = _make_kernel(num_conv, h3)

    in_specs = [pl.BlockSpec((hh, ww * cin), lambda i: (i, 0))]
    for a in ops:  # weights / selection matrices: full array, resident across grid
        in_specs.append(pl.BlockSpec(a.shape, lambda i, _nd=a.ndim: (0,) * _nd))
    out_specs = pl.BlockSpec((1, 1, outp), lambda i: (i, 0, 0))

    bytes_accessed = 4 * (x2d.size + n * outp + sum(int(a.size) for a in ops))
    cost = pl.CostEstimate(flops=n * meta["flops_per_sample"],
                           transcendentals=0,
                           bytes_accessed=int(bytes_accessed))

    out = pl.pallas_call(
        kernel,
        grid=(n,),
        in_specs=in_specs,
        out_specs=out_specs,
        out_shape=jax.ShapeDtypeStruct((n, 1, outp), jnp.float32),
        compiler_params=pltpu.CompilerParams(
            dimension_semantics=("parallel",)),
        cost_estimate=cost,
    )(x2d, *ops)
    return out[:, 0, :meta["out_features"]]


# --------------------------- reference (pure JAX) --------------------------- #

def reference_forward(state_nchw, params):
    y = state_nchw
    for (w, b, gamma, beta, mean, var) in params["conv"]:
        y = lax.conv_general_dilated(
            y, w, window_strides=(1, 1), padding=((1, 1), (1, 1)),
            dimension_numbers=("NCHW", "OIHW", "NCHW"))
        y = y + b[None, :, None, None]
        y = jnp.maximum(y, 0.0)
        inv = gamma / jnp.sqrt(var + EPS)
        y = y * inv[None, :, None, None] + (beta - mean * inv)[None, :, None, None]
        n, c, h, wd = y.shape
        y = y.reshape(n, c, h // 2, 2, wd // 2, 2).max(axis=(3, 5))
    n = y.shape[0]
    feat = y.reshape(n, -1)
    w1, b1, w2, b2 = params["fc"]
    h = jnp.maximum(feat @ w1 + b1, 0.0)
    return jnp.maximum(h @ w2 + b2, 0.0)


# ------------------------------ parameters ---------------------------------- #

def init_params(key, in_channels, out_features, num_features):
    keys = iter(jax.random.split(key, 32))
    conv_cfg = [(in_channels, 8), (8, 16), (16, 32)]
    conv_params = []
    for cin, cout in conv_cfg:
        w = 0.1 * jax.random.normal(next(keys), (cout, cin, 3, 3), jnp.float32)
        b = 0.05 * jax.random.normal(next(keys), (cout,), jnp.float32)
        gamma = 1.0 + 0.1 * jax.random.normal(next(keys), (cout,), jnp.float32)
        beta = 0.05 * jax.random.normal(next(keys), (cout,), jnp.float32)
        mean = 0.02 * jax.random.normal(next(keys), (cout,), jnp.float32)
        var = 0.5 + 0.5 * jax.nn.softplus(
            jax.random.normal(next(keys), (cout,), jnp.float32))
        conv_params.append((w, b, gamma, beta, mean, var))
    w1 = 0.1 * jax.random.normal(next(keys), (num_features, 64), jnp.float32)
    b1 = 0.05 * jax.random.normal(next(keys), (64,), jnp.float32)
    w2 = 0.1 * jax.random.normal(next(keys), (64, out_features), jnp.float32)
    b2 = 0.05 * jax.random.normal(next(keys), (out_features,), jnp.float32)
    return {"conv": conv_params, "fc": (w1, b1, w2, b2)}


# --------------------------------- main -------------------------------------- #

if __name__ == "__main__":
    batch, in_channels, height, width, out_features = 2, 4, 16, 16, 8
    # DQN.__get_num_features: (W//8) * (H//8) * 32
    num_features = (width // 8) * (height // 8) * 32  # = 128

    key = jax.random.PRNGKey(0)
    k_state, k_params = jax.random.split(key)
    state = jax.random.normal(
        k_state, (batch, in_channels, height, width), jnp.float32)  # NCHW
    params = init_params(k_params, in_channels, out_features, num_features)

    # One-time weight preprocessing (band/selection matrices, BN fold, W1 perm).
    ops, meta = prepare_inputs(params, height, width)

    fwd = jax.jit(lambda s, o: dqn_forward(s, o, meta))
    out = jax.block_until_ready(fwd(state, ops))
    ref = jax.block_until_ready(reference_forward(state, params))

    assert out.shape == (batch, out_features), out.shape
    max_err = float(jnp.max(jnp.abs(out - ref)))
    # all matmuls run in f32 (selection matmuls are exact 0/1 copies)
    assert max_err < 5e-3, f"mismatch vs reference: max_err={max_err}"
    print("KERNEL_OK")
</pallas_src>

<mosaic_0001>
module attributes {stable_mosaic.version = 11 : i64} {
  func.func @kernel(%arg0: i32, %arg1: memref<16x64xf32, #tpu.memory_space<vmem>>, %arg2: memref<3x64x128xf32, #tpu.memory_space<vmem>>, %arg3: memref<2x16x16xf32, #tpu.memory_space<vmem>>, %arg4: memref<2x128x64xf32, #tpu.memory_space<vmem>>, %arg5: memref<2x8x16xf32, #tpu.memory_space<vmem>>, %arg6: memref<1x128xf32, #tpu.memory_space<vmem>>, %arg7: memref<1x128xf32, #tpu.memory_space<vmem>>, %arg8: memref<1x128xf32, #tpu.memory_space<vmem>>, %arg9: memref<3x64x128xf32, #tpu.memory_space<vmem>>, %arg10: memref<2x8x8xf32, #tpu.memory_space<vmem>>, %arg11: memref<2x128x64xf32, #tpu.memory_space<vmem>>, %arg12: memref<2x4x8xf32, #tpu.memory_space<vmem>>, %arg13: memref<1x128xf32, #tpu.memory_space<vmem>>, %arg14: memref<1x128xf32, #tpu.memory_space<vmem>>, %arg15: memref<1x128xf32, #tpu.memory_space<vmem>>, %arg16: memref<3x64x128xf32, #tpu.memory_space<vmem>>, %arg17: memref<2x4x4xf32, #tpu.memory_space<vmem>>, %arg18: memref<2x128x64xf32, #tpu.memory_space<vmem>>, %arg19: memref<2x2x4xf32, #tpu.memory_space<vmem>>, %arg20: memref<1x128xf32, #tpu.memory_space<vmem>>, %arg21: memref<1x128xf32, #tpu.memory_space<vmem>>, %arg22: memref<1x128xf32, #tpu.memory_space<vmem>>, %arg23: memref<2x64x64xf32, #tpu.memory_space<vmem>>, %arg24: memref<1x64xf32, #tpu.memory_space<vmem>>, %arg25: memref<64x128xf32, #tpu.memory_space<vmem>>, %arg26: memref<1x128xf32, #tpu.memory_space<vmem>>, %arg27: memref<1x1x128xf32, #tpu.memory_space<vmem>>) attributes {dimension_semantics = [#tpu.dimension_semantics<parallel>], iteration_bounds = array<i64: 2>, scalar_prefetch = 0 : i64, scratch_operands = 0 : i64, tpu.core_type = #tpu.core_type<tc>, window_params = [{transform_indices = @transform_0, window_bounds = array<i64: 16, 64>}, {pipeline_mode = #tpu.pipeline_mode<synchronous>, transform_indices = @transform_1, window_bounds = array<i64: 3, 64, 128>}, {pipeline_mode = #tpu.pipeline_mode<synchronous>, transform_indices = @transform_2, window_bounds = array<i64: 2, 16, 16>}, {pipeline_mode = #tpu.pipeline_mode<synchronous>, transform_indices = @transform_3, window_bounds = array<i64: 2, 128, 64>}, {pipeline_mode = #tpu.pipeline_mode<synchronous>, transform_indices = @transform_4, window_bounds = array<i64: 2, 8, 16>}, {pipeline_mode = #tpu.pipeline_mode<synchronous>, transform_indices = @transform_5, window_bounds = array<i64: 1, 128>}, {pipeline_mode = #tpu.pipeline_mode<synchronous>, transform_indices = @transform_6, window_bounds = array<i64: 1, 128>}, {pipeline_mode = #tpu.pipeline_mode<synchronous>, transform_indices = @transform_7, window_bounds = array<i64: 1, 128>}, {pipeline_mode = #tpu.pipeline_mode<synchronous>, transform_indices = @transform_8, window_bounds = array<i64: 3, 64, 128>}, {pipeline_mode = #tpu.pipeline_mode<synchronous>, transform_indices = @transform_9, window_bounds = array<i64: 2, 8, 8>}, {pipeline_mode = #tpu.pipeline_mode<synchronous>, transform_indices = @transform_10, window_bounds = array<i64: 2, 128, 64>}, {pipeline_mode = #tpu.pipeline_mode<synchronous>, transform_indices = @transform_11, window_bounds = array<i64: 2, 4, 8>}, {pipeline_mode = #tpu.pipeline_mode<synchronous>, transform_indices = @transform_12, window_bounds = array<i64: 1, 128>}, {pipeline_mode = #tpu.pipeline_mode<synchronous>, transform_indices = @transform_13, window_bounds = array<i64: 1, 128>}, {pipeline_mode = #tpu.pipeline_mode<synchronous>, transform_indices = @transform_14, window_bounds = array<i64: 1, 128>}, {pipeline_mode = #tpu.pipeline_mode<synchronous>, transform_indices = @transform_15, window_bounds = array<i64: 3, 64, 128>}, {pipeline_mode = #tpu.pipeline_mode<synchronous>, transform_indices = @transform_16, window_bounds = array<i64: 2, 4, 4>}, {pipeline_mode = #tpu.pipeline_mode<synchronous>, transform_indices = @transform_17, window_bounds = array<i64: 2, 128, 64>}, {pipeline_mode = #tpu.pipeline_mode<synchronous>, transform_indices = @transform_18, window_bounds = array<i64: 2, 2, 4>}, {pipeline_mode = #tpu.pipeline_mode<synchronous>, transform_indices = @transform_19, window_bounds = array<i64: 1, 128>}, {pipeline_mode = #tpu.pipeline_mode<synchronous>, transform_indices = @transform_20, window_bounds = array<i64: 1, 128>}, {pipeline_mode = #tpu.pipeline_mode<synchronous>, transform_indices = @transform_21, window_bounds = array<i64: 1, 128>}, {pipeline_mode = #tpu.pipeline_mode<synchronous>, transform_indices = @transform_22, window_bounds = array<i64: 2, 64, 64>}, {pipeline_mode = #tpu.pipeline_mode<synchronous>, transform_indices = @transform_23, window_bounds = array<i64: 1, 64>}, {pipeline_mode = #tpu.pipeline_mode<synchronous>, transform_indices = @transform_24, window_bounds = array<i64: 64, 128>}, {pipeline_mode = #tpu.pipeline_mode<synchronous>, transform_indices = @transform_25, window_bounds = array<i64: 1, 128>}, {transform_indices = @transform_26, window_bounds = array<i64: 1, 1, 128>}]} {
    %c0 = arith.constant 0 : index
    %c0_0 = arith.constant 0 : index
    %0 = vector.load %arg1[%c0, %c0_0] : memref<16x64xf32, #tpu.memory_space<vmem>>, vector<16x64xf32>
    %c1 = arith.constant 1 : index
    %c0_1 = arith.constant 0 : index
    %c0_2 = arith.constant 0 : index
    %1 = vector.load %arg2[%c1, %c0_1, %c0_2] : memref<3x64x128xf32, #tpu.memory_space<vmem>>, vector<1x64x128xf32>
    %2 = vector.shape_cast %1 : vector<1x64x128xf32> to vector<64x128xf32>
    %cst = arith.constant dense<0.000000e+00> : vector<16x128xf32>
    %3 = tpu.matmul %0, %2, %cst {dimension_numbers = #tpu.dot_dimension_numbers<[1], [0], [0], [1], [0, 0, 1, 1], [], []>} : vector<16x64xf32>, vector<64x128xf32>, vector<16x128xf32> -> vector<16x128xf32>
    %c0_3 = arith.constant 0 : index
    %c0_4 = arith.constant 0 : index
    %c0_5 = arith.constant 0 : index
    %4 = vector.load %arg3[%c0_3, %c0_4, %c0_5] : memref<2x16x16xf32, #tpu.memory_space<vmem>>, vector<1x16x16xf32>
    %5 = vector.shape_cast %4 : vector<1x16x16xf32> to vector<16x16xf32>
    %cst_6 = arith.constant dense<0.000000e+00> : vector<16x64xf32>
    %6 = tpu.matmul %5, %0, %cst_6 {dimension_numbers = #tpu.dot_dimension_numbers<[1], [0], [0], [1], [0, 0, 1, 1], [], []>} : vector<16x16xf32>, vector<16x64xf32>, vector<16x64xf32> -> vector<16x64xf32>
    %c0_7 = arith.constant 0 : index
    %c0_8 = arith.constant 0 : index
    %c0_9 = arith.constant 0 : index
    %7 = vector.load %arg2[%c0_7, %c0_8, %c0_9] : memref<3x64x128xf32, #tpu.memory_space<vmem>>, vector<1x64x128xf32>
    %8 = vector.shape_cast %7 : vector<1x64x128xf32> to vector<64x128xf32>
    %cst_10 = arith.constant dense<0.000000e+00> : vector<16x128xf32>
    %9 = tpu.matmul %6, %8, %cst_10 {dimension_numbers = #tpu.dot_dimension_numbers<[1], [0], [0], [1], [0, 0, 1, 1], [], []>} : vector<16x64xf32>, vector<64x128xf32>, vector<16x128xf32> -> vector<16x128xf32>
    %10 = arith.addf %3, %9 : vector<16x128xf32>
    %c1_11 = arith.constant 1 : index
    %c0_12 = arith.constant 0 : index
    %c0_13 = arith.constant 0 : index
    %11 = vector.load %arg3[%c1_11, %c0_12, %c0_13] : memref<2x16x16xf32, #tpu.memory_space<vmem>>, vector<1x16x16xf32>
    %12 = vector.shape_cast %11 : vector<1x16x16xf32> to vector<16x16xf32>
    %cst_14 = arith.constant dense<0.000000e+00> : vector<16x64xf32>
    %13 = tpu.matmul %12, %0, %cst_14 {dimension_numbers = #tpu.dot_dimension_numbers<[1], [0], [0], [1], [0, 0, 1, 1], [], []>} : vector<16x16xf32>, vector<16x64xf32>, vector<16x64xf32> -> vector<16x64xf32>
    %c2 = arith.constant 2 : index
    %c0_15 = arith.constant 0 : index
    %c0_16 = arith.constant 0 : index
    %14 = vector.load %arg2[%c2, %c0_15, %c0_16] : memref<3x64x128xf32, #tpu.memory_space<vmem>>, vector<1x64x128xf32>
    %15 = vector.shape_cast %14 : vector<1x64x128xf32> to vector<64x128xf32>
    %cst_17 = arith.constant dense<0.000000e+00> : vector<16x128xf32>
    %16 = tpu.matmul %13, %15, %cst_17 {dimension_numbers = #tpu.dot_dimension_numbers<[1], [0], [0], [1], [0, 0, 1, 1], [], []>} : vector<16x64xf32>, vector<64x128xf32>, vector<16x128xf32> -> vector<16x128xf32>
    %17 = arith.addf %10, %16 : vector<16x128xf32>
    %c0_18 = arith.constant 0 : index
    %c0_19 = arith.constant 0 : index
    %18 = vector.load %arg6[%c0_18, %c0_19] : memref<1x128xf32, #tpu.memory_space<vmem>>, vector<1x128xf32>
    %19 = vector.broadcast %18 : vector<1x128xf32> to vector<16x128xf32>
    %20 = arith.addf %17, %19 : vector<16x128xf32>
    %cst_20 = arith.constant 0.000000e+00 : f32
    %21 = vector.broadcast %cst_20 : f32 to vector<16x128xf32>
    %22 = arith.maximumf %20, %21 : vector<16x128xf32>
    %c0_21 = arith.constant 0 : index
    %c0_22 = arith.constant 0 : index
    %23 = vector.load %arg7[%c0_21, %c0_22] : memref<1x128xf32, #tpu.memory_space<vmem>>, vector<1x128xf32>
    %24 = vector.broadcast %23 : vector<1x128xf32> to vector<16x128xf32>
    %25 = arith.mulf %22, %24 : vector<16x128xf32>
    %c0_23 = arith.constant 0 : index
    %c0_24 = arith.constant 0 : index
    %26 = vector.load %arg8[%c0_23, %c0_24] : memref<1x128xf32, #tpu.memory_space<vmem>>, vector<1x128xf32>
    %27 = vector.broadcast %26 : vector<1x128xf32> to vector<16x128xf32>
    %28 = arith.addf %25, %27 : vector<16x128xf32>
    %c0_25 = arith.constant 0 : index
    %c0_26 = arith.constant 0 : index
    %c0_27 = arith.constant 0 : index
    %29 = vector.load %arg4[%c0_25, %c0_26, %c0_27] : memref<2x128x64xf32, #tpu.memory_space<vmem>>, vector<1x128x64xf32>
    %30 = vector.shape_cast %29 : vector<1x128x64xf32> to vector<128x64xf32>
    %cst_28 = arith.constant dense<0.000000e+00> : vector<16x64xf32>
    %31 = tpu.matmul %28, %30, %cst_28 {dimension_numbers = #tpu.dot_dimension_numbers<[1], [0], [0], [1], [0, 0, 1, 1], [], []>} : vector<16x128xf32>, vector<128x64xf32>, vector<16x64xf32> -> vector<16x64xf32>
    %c1_29 = arith.constant 1 : index
    %c0_30 = arith.constant 0 : index
    %c0_31 = arith.constant 0 : index
    %32 = vector.load %arg4[%c1_29, %c0_30, %c0_31] : memref<2x128x64xf32, #tpu.memory_space<vmem>>, vector<1x128x64xf32>
    %33 = vector.shape_cast %32 : vector<1x128x64xf32> to vector<128x64xf32>
    %cst_32 = arith.constant dense<0.000000e+00> : vector<16x64xf32>
    %34 = tpu.matmul %28, %33, %cst_32 {dimension_numbers = #tpu.dot_dimension_numbers<[1], [0], [0], [1], [0, 0, 1, 1], [], []>} : vector<16x128xf32>, vector<128x64xf32>, vector<16x64xf32> -> vector<16x64xf32>
    %35 = arith.maximumf %31, %34 : vector<16x64xf32>
    %c0_33 = arith.constant 0 : index
    %c0_34 = arith.constant 0 : index
    %c0_35 = arith.constant 0 : index
    %36 = vector.load %arg5[%c0_33, %c0_34, %c0_35] : memref<2x8x16xf32, #tpu.memory_space<vmem>>, vector<1x8x16xf32>
    %37 = vector.shape_cast %36 : vector<1x8x16xf32> to vector<8x16xf32>
    %cst_36 = arith.constant dense<0.000000e+00> : vector<8x64xf32>
    %38 = tpu.matmul %37, %35, %cst_36 {dimension_numbers = #tpu.dot_dimension_numbers<[1], [0], [0], [1], [0, 0, 1, 1], [], []>} : vector<8x16xf32>, vector<16x64xf32>, vector<8x64xf32> -> vector<8x64xf32>
    %c1_37 = arith.constant 1 : index
    %c0_38 = arith.constant 0 : index
    %c0_39 = arith.constant 0 : index
    %39 = vector.load %arg5[%c1_37, %c0_38, %c0_39] : memref<2x8x16xf32, #tpu.memory_space<vmem>>, vector<1x8x16xf32>
    %40 = vector.shape_cast %39 : vector<1x8x16xf32> to vector<8x16xf32>
    %cst_40 = arith.constant dense<0.000000e+00> : vector<8x64xf32>
    %41 = tpu.matmul %40, %35, %cst_40 {dimension_numbers = #tpu.dot_dimension_numbers<[1], [0], [0], [1], [0, 0, 1, 1], [], []>} : vector<8x16xf32>, vector<16x64xf32>, vector<8x64xf32> -> vector<8x64xf32>
    %42 = arith.maximumf %38, %41 : vector<8x64xf32>
    %c1_41 = arith.constant 1 : index
    %c0_42 = arith.constant 0 : index
    %c0_43 = arith.constant 0 : index
    %43 = vector.load %arg9[%c1_41, %c0_42, %c0_43] : memref<3x64x128xf32, #tpu.memory_space<vmem>>, vector<1x64x128xf32>
    %44 = vector.shape_cast %43 : vector<1x64x128xf32> to vector<64x128xf32>
    %cst_44 = arith.constant dense<0.000000e+00> : vector<8x128xf32>
    %45 = tpu.matmul %42, %44, %cst_44 {dimension_numbers = #tpu.dot_dimension_numbers<[1], [0], [0], [1], [0, 0, 1, 1], [], []>} : vector<8x64xf32>, vector<64x128xf32>, vector<8x128xf32> -> vector<8x128xf32>
    %c0_45 = arith.constant 0 : index
    %c0_46 = arith.constant 0 : index
    %c0_47 = arith.constant 0 : index
    %46 = vector.load %arg10[%c0_45, %c0_46, %c0_47] : memref<2x8x8xf32, #tpu.memory_space<vmem>>, vector<1x8x8xf32>
    %47 = vector.shape_cast %46 : vector<1x8x8xf32> to vector<8x8xf32>
    %cst_48 = arith.constant dense<0.000000e+00> : vector<8x64xf32>
    %48 = tpu.matmul %47, %42, %cst_48 {dimension_numbers = #tpu.dot_dimension_numbers<[1], [0], [0], [1], [0, 0, 1, 1], [], []>} : vector<8x8xf32>, vector<8x64xf32>, vector<8x64xf32> -> vector<8x64xf32>
    %c0_49 = arith.constant 0 : index
    %c0_50 = arith.constant 0 : index
    %c0_51 = arith.constant 0 : index
    %49 = vector.load %arg9[%c0_49, %c0_50, %c0_51] : memref<3x64x128xf32, #tpu.memory_space<vmem>>, vector<1x64x128xf32>
    %50 = vector.shape_cast %49 : vector<1x64x128xf32> to vector<64x128xf32>
    %cst_52 = arith.constant dense<0.000000e+00> : vector<8x128xf32>
    %51 = tpu.matmul %48, %50, %cst_52 {dimension_numbers = #tpu.dot_dimension_numbers<[1], [0], [0], [1], [0, 0, 1, 1], [], []>} : vector<8x64xf32>, vector<64x128xf32>, vector<8x128xf32> -> vector<8x128xf32>
    %52 = arith.addf %45, %51 : vector<8x128xf32>
    %c1_53 = arith.constant 1 : index
    %c0_54 = arith.constant 0 : index
    %c0_55 = arith.constant 0 : index
    %53 = vector.load %arg10[%c1_53, %c0_54, %c0_55] : memref<2x8x8xf32, #tpu.memory_space<vmem>>, vector<1x8x8xf32>
    %54 = vector.shape_cast %53 : vector<1x8x8xf32> to vector<8x8xf32>
    %cst_56 = arith.constant dense<0.000000e+00> : vector<8x64xf32>
    %55 = tpu.matmul %54, %42, %cst_56 {dimension_numbers = #tpu.dot_dimension_numbers<[1], [0], [0], [1], [0, 0, 1, 1], [], []>} : vector<8x8xf32>, vector<8x64xf32>, vector<8x64xf32> -> vector<8x64xf32>
    %c2_57 = arith.constant 2 : index
    %c0_58 = arith.constant 0 : index
    %c0_59 = arith.constant 0 : index
    %56 = vector.load %arg9[%c2_57, %c0_58, %c0_59] : memref<3x64x128xf32, #tpu.memory_space<vmem>>, vector<1x64x128xf32>
    %57 = vector.shape_cast %56 : vector<1x64x128xf32> to vector<64x128xf32>
    %cst_60 = arith.constant dense<0.000000e+00> : vector<8x128xf32>
    %58 = tpu.matmul %55, %57, %cst_60 {dimension_numbers = #tpu.dot_dimension_numbers<[1], [0], [0], [1], [0, 0, 1, 1], [], []>} : vector<8x64xf32>, vector<64x128xf32>, vector<8x128xf32> -> vector<8x128xf32>
    %59 = arith.addf %52, %58 : vector<8x128xf32>
    %c0_61 = arith.constant 0 : index
    %c0_62 = arith.constant 0 : index
    %60 = vector.load %arg13[%c0_61, %c0_62] : memref<1x128xf32, #tpu.memory_space<vmem>>, vector<1x128xf32>
    %61 = vector.broadcast %60 : vector<1x128xf32> to vector<8x128xf32>
    %62 = arith.addf %59, %61 : vector<8x128xf32>
    %cst_63 = arith.constant 0.000000e+00 : f32
    %63 = vector.broadcast %cst_63 : f32 to vector<8x128xf32>
    %64 = arith.maximumf %62, %63 : vector<8x128xf32>
    %c0_64 = arith.constant 0 : index
    %c0_65 = arith.constant 0 : index
    %65 = vector.load %arg14[%c0_64, %c0_65] : memref<1x128xf32, #tpu.memory_space<vmem>>, vector<1x128xf32>
    %66 = vector.broadcast %65 : vector<1x128xf32> to vector<8x128xf32>
    %67 = arith.mulf %64, %66 : vector<8x128xf32>
    %c0_66 = arith.constant 0 : index
    %c0_67 = arith.constant 0 : index
    %68 = vector.load %arg15[%c0_66, %c0_67] : memref<1x128xf32, #tpu.memory_space<vmem>>, vector<1x128xf32>
    %69 = vector.broadcast %68 : vector<1x128xf32> to vector<8x128xf32>
    %70 = arith.addf %67, %69 : vector<8x128xf32>
    %c0_68 = arith.constant 0 : index
    %c0_69 = arith.constant 0 : index
    %c0_70 = arith.constant 0 : index
    %71 = vector.load %arg11[%c0_68, %c0_69, %c0_70] : memref<2x128x64xf32, #tpu.memory_space<vmem>>, vector<1x128x64xf32>
    %72 = vector.shape_cast %71 : vector<1x128x64xf32> to vector<128x64xf32>
    %cst_71 = arith.constant dense<0.000000e+00> : vector<8x64xf32>
    %73 = tpu.matmul %70, %72, %cst_71 {dimension_numbers = #tpu.dot_dimension_numbers<[1], [0], [0], [1], [0, 0, 1, 1], [], []>} : vector<8x128xf32>, vector<128x64xf32>, vector<8x64xf32> -> vector<8x64xf32>
    %c1_72 = arith.constant 1 : index
    %c0_73 = arith.constant 0 : index
    %c0_74 = arith.constant 0 : index
    %74 = vector.load %arg11[%c1_72, %c0_73, %c0_74] : memref<2x128x64xf32, #tpu.memory_space<vmem>>, vector<1x128x64xf32>
    %75 = vector.shape_cast %74 : vector<1x128x64xf32> to vector<128x64xf32>
    %cst_75 = arith.constant dense<0.000000e+00> : vector<8x64xf32>
    %76 = tpu.matmul %70, %75, %cst_75 {dimension_numbers = #tpu.dot_dimension_numbers<[1], [0], [0], [1], [0, 0, 1, 1], [], []>} : vector<8x128xf32>, vector<128x64xf32>, vector<8x64xf32> -> vector<8x64xf32>
    %77 = arith.maximumf %73, %76 : vector<8x64xf32>
    %c0_76 = arith.constant 0 : index
    %c0_77 = arith.constant 0 : index
    %c0_78 = arith.constant 0 : index
    %78 = vector.load %arg12[%c0_76, %c0_77, %c0_78] : memref<2x4x8xf32, #tpu.memory_space<vmem>>, vector<1x4x8xf32>
    %79 = vector.shape_cast %78 : vector<1x4x8xf32> to vector<4x8xf32>
    %cst_79 = arith.constant dense<0.000000e+00> : vector<4x64xf32>
    %80 = tpu.matmul %79, %77, %cst_79 {dimension_numbers = #tpu.dot_dimension_numbers<[1], [0], [0], [1], [0, 0, 1, 1], [], []>} : vector<4x8xf32>, vector<8x64xf32>, vector<4x64xf32> -> vector<4x64xf32>
    %c1_80 = arith.constant 1 : index
    %c0_81 = arith.constant 0 : index
    %c0_82 = arith.constant 0 : index
    %81 = vector.load %arg12[%c1_80, %c0_81, %c0_82] : memref<2x4x8xf32, #tpu.memory_space<vmem>>, vector<1x4x8xf32>
    %82 = vector.shape_cast %81 : vector<1x4x8xf32> to vector<4x8xf32>
    %cst_83 = arith.constant dense<0.000000e+00> : vector<4x64xf32>
    %83 = tpu.matmul %82, %77, %cst_83 {dimension_numbers = #tpu.dot_dimension_numbers<[1], [0], [0], [1], [0, 0, 1, 1], [], []>} : vector<4x8xf32>, vector<8x64xf32>, vector<4x64xf32> -> vector<4x64xf32>
    %84 = arith.maximumf %80, %83 : vector<4x64xf32>
    %c1_84 = arith.constant 1 : index
    %c0_85 = arith.constant 0 : index
    %c0_86 = arith.constant 0 : index
    %85 = vector.load %arg16[%c1_84, %c0_85, %c0_86] : memref<3x64x128xf32, #tpu.memory_space<vmem>>, vector<1x64x128xf32>
    %86 = vector.shape_cast %85 : vector<1x64x128xf32> to vector<64x128xf32>
    %cst_87 = arith.constant dense<0.000000e+00> : vector<4x128xf32>
    %87 = tpu.matmul %84, %86, %cst_87 {dimension_numbers = #tpu.dot_dimension_numbers<[1], [0], [0], [1], [0, 0, 1, 1], [], []>} : vector<4x64xf32>, vector<64x128xf32>, vector<4x128xf32> -> vector<4x128xf32>
    %c0_88 = arith.constant 0 : index
    %c0_89 = arith.constant 0 : index
    %c0_90 = arith.constant 0 : index
    %88 = vector.load %arg17[%c0_88, %c0_89, %c0_90] : memref<2x4x4xf32, #tpu.memory_space<vmem>>, vector<1x4x4xf32>
    %89 = vector.shape_cast %88 : vector<1x4x4xf32> to vector<4x4xf32>
    %cst_91 = arith.constant dense<0.000000e+00> : vector<4x64xf32>
    %90 = tpu.matmul %89, %84, %cst_91 {dimension_numbers = #tpu.dot_dimension_numbers<[1], [0], [0], [1], [0, 0, 1, 1], [], []>} : vector<4x4xf32>, vector<4x64xf32>, vector<4x64xf32> -> vector<4x64xf32>
    %c0_92 = arith.constant 0 : index
    %c0_93 = arith.constant 0 : index
    %c0_94 = arith.constant 0 : index
    %91 = vector.load %arg16[%c0_92, %c0_93, %c0_94] : memref<3x64x128xf32, #tpu.memory_space<vmem>>, vector<1x64x128xf32>
    %92 = vector.shape_cast %91 : vector<1x64x128xf32> to vector<64x128xf32>
    %cst_95 = arith.constant dense<0.000000e+00> : vector<4x128xf32>
    %93 = tpu.matmul %90, %92, %cst_95 {dimension_numbers = #tpu.dot_dimension_numbers<[1], [0], [0], [1], [0, 0, 1, 1], [], []>} : vector<4x64xf32>, vector<64x128xf32>, vector<4x128xf32> -> vector<4x128xf32>
    %94 = arith.addf %87, %93 : vector<4x128xf32>
    %c1_96 = arith.constant 1 : index
    %c0_97 = arith.constant 0 : index
    %c0_98 = arith.constant 0 : index
    %95 = vector.load %arg17[%c1_96, %c0_97, %c0_98] : memref<2x4x4xf32, #tpu.memory_space<vmem>>, vector<1x4x4xf32>
    %96 = vector.shape_cast %95 : vector<1x4x4xf32> to vector<4x4xf32>
    %cst_99 = arith.constant dense<0.000000e+00> : vector<4x64xf32>
    %97 = tpu.matmul %96, %84, %cst_99 {dimension_numbers = #tpu.dot_dimension_numbers<[1], [0], [0], [1], [0, 0, 1, 1], [], []>} : vector<4x4xf32>, vector<4x64xf32>, vector<4x64xf32> -> vector<4x64xf32>
    %c2_100 = arith.constant 2 : index
    %c0_101 = arith.constant 0 : index
    %c0_102 = arith.constant 0 : index
    %98 = vector.load %arg16[%c2_100, %c0_101, %c0_102] : memref<3x64x128xf32, #tpu.memory_space<vmem>>, vector<1x64x128xf32>
    %99 = vector.shape_cast %98 : vector<1x64x128xf32> to vector<64x128xf32>
    %cst_103 = arith.constant dense<0.000000e+00> : vector<4x128xf32>
    %100 = tpu.matmul %97, %99, %cst_103 {dimension_numbers = #tpu.dot_dimension_numbers<[1], [0], [0], [1], [0, 0, 1, 1], [], []>} : vector<4x64xf32>, vector<64x128xf32>, vector<4x128xf32> -> vector<4x128xf32>
    %101 = arith.addf %94, %100 : vector<4x128xf32>
    %c0_104 = arith.constant 0 : index
    %c0_105 = arith.constant 0 : index
    %102 = vector.load %arg20[%c0_104, %c0_105] : memref<1x128xf32, #tpu.memory_space<vmem>>, vector<1x128xf32>
    %103 = vector.broadcast %102 : vector<1x128xf32> to vector<4x128xf32>
    %104 = arith.addf %101, %103 : vector<4x128xf32>
    %cst_106 = arith.constant 0.000000e+00 : f32
    %105 = vector.broadcast %cst_106 : f32 to vector<4x128xf32>
    %106 = arith.maximumf %104, %105 : vector<4x128xf32>
    %c0_107 = arith.constant 0 : index
    %c0_108 = arith.constant 0 : index
    %107 = vector.load %arg21[%c0_107, %c0_108] : memref<1x128xf32, #tpu.memory_space<vmem>>, vector<1x128xf32>
    %108 = vector.broadcast %107 : vector<1x128xf32> to vector<4x128xf32>
    %109 = arith.mulf %106, %108 : vector<4x128xf32>
    %c0_109 = arith.constant 0 : index
    %c0_110 = arith.constant 0 : index
    %110 = vector.load %arg22[%c0_109, %c0_110] : memref<1x128xf32, #tpu.memory_space<vmem>>, vector<1x128xf32>
    %111 = vector.broadcast %110 : vector<1x128xf32> to vector<4x128xf32>
    %112 = arith.addf %109, %111 : vector<4x128xf32>
    %c0_111 = arith.constant 0 : index
    %c0_112 = arith.constant 0 : index
    %c0_113 = arith.constant 0 : index
    %113 = vector.load %arg18[%c0_111, %c0_112, %c0_113] : memref<2x128x64xf32, #tpu.memory_space<vmem>>, vector<1x128x64xf32>
    %114 = vector.shape_cast %113 : vector<1x128x64xf32> to vector<128x64xf32>
    %cst_114 = arith.constant dense<0.000000e+00> : vector<4x64xf32>
    %115 = tpu.matmul %112, %114, %cst_114 {dimension_numbers = #tpu.dot_dimension_numbers<[1], [0], [0], [1], [0, 0, 1, 1], [], []>} : vector<4x128xf32>, vector<128x64xf32>, vector<4x64xf32> -> vector<4x64xf32>
    %c1_115 = arith.constant 1 : index
    %c0_116 = arith.constant 0 : index
    %c0_117 = arith.constant 0 : index
    %116 = vector.load %arg18[%c1_115, %c0_116, %c0_117] : memref<2x128x64xf32, #tpu.memory_space<vmem>>, vector<1x128x64xf32>
    %117 = vector.shape_cast %116 : vector<1x128x64xf32> to vector<128x64xf32>
    %cst_118 = arith.constant dense<0.000000e+00> : vector<4x64xf32>
    %118 = tpu.matmul %112, %117, %cst_118 {dimension_numbers = #tpu.dot_dimension_numbers<[1], [0], [0], [1], [0, 0, 1, 1], [], []>} : vector<4x128xf32>, vector<128x64xf32>, vector<4x64xf32> -> vector<4x64xf32>
    %119 = arith.maximumf %115, %118 : vector<4x64xf32>
    %c0_119 = arith.constant 0 : index
    %c0_120 = arith.constant 0 : index
    %c0_121 = arith.constant 0 : index
    %120 = vector.load %arg19[%c0_119, %c0_120, %c0_121] : memref<2x2x4xf32, #tpu.memory_space<vmem>>, vector<1x2x4xf32>
    %121 = vector.shape_cast %120 : vector<1x2x4xf32> to vector<2x4xf32>
    %cst_122 = arith.constant dense<0.000000e+00> : vector<2x64xf32>
    %122 = tpu.matmul %121, %119, %cst_122 {dimension_numbers = #tpu.dot_dimension_numbers<[1], [0], [0], [1], [0, 0, 1, 1], [], []>} : vector<2x4xf32>, vector<4x64xf32>, vector<2x64xf32> -> vector<2x64xf32>
    %c1_123 = arith.constant 1 : index
    %c0_124 = arith.constant 0 : index
    %c0_125 = arith.constant 0 : index
    %123 = vector.load %arg19[%c1_123, %c0_124, %c0_125] : memref<2x2x4xf32, #tpu.memory_space<vmem>>, vector<1x2x4xf32>
    %124 = vector.shape_cast %123 : vector<1x2x4xf32> to vector<2x4xf32>
    %cst_126 = arith.constant dense<0.000000e+00> : vector<2x64xf32>
    %125 = tpu.matmul %124, %119, %cst_126 {dimension_numbers = #tpu.dot_dimension_numbers<[1], [0], [0], [1], [0, 0, 1, 1], [], []>} : vector<2x4xf32>, vector<4x64xf32>, vector<2x64xf32> -> vector<2x64xf32>
    %126 = arith.maximumf %122, %125 : vector<2x64xf32>
    %127 = vector.extract_strided_slice %126 {offsets = [0, 0], sizes = [1, 64], strides = [1, 1]} : vector<2x64xf32> to vector<1x64xf32>
    %c0_127 = arith.constant 0 : index
    %c0_128 = arith.constant 0 : index
    %c0_129 = arith.constant 0 : index
    %128 = vector.load %arg23[%c0_127, %c0_128, %c0_129] : memref<2x64x64xf32, #tpu.memory_space<vmem>>, vector<1x64x64xf32>
    %129 = vector.shape_cast %128 : vector<1x64x64xf32> to vector<64x64xf32>
    %cst_130 = arith.constant dense<0.000000e+00> : vector<1x64xf32>
    %130 = tpu.matmul %127, %129, %cst_130 {dimension_numbers = #tpu.dot_dimension_numbers<[1], [0], [0], [1], [0, 0, 1, 1], [], []>} : vector<1x64xf32>, vector<64x64xf32>, vector<1x64xf32> -> vector<1x64xf32>
    %131 = vector.extract_strided_slice %126 {offsets = [1, 0], sizes = [1, 64], strides = [1, 1]} : vector<2x64xf32> to vector<1x64xf32>
    %c1_131 = arith.constant 1 : index
    %c0_132 = arith.constant 0 : index
    %c0_133 = arith.constant 0 : index
    %132 = vector.load %arg23[%c1_131, %c0_132, %c0_133] : memref<2x64x64xf32, #tpu.memory_space<vmem>>, vector<1x64x64xf32>
    %133 = vector.shape_cast %132 : vector<1x64x64xf32> to vector<64x64xf32>
    %cst_134 = arith.constant dense<0.000000e+00> : vector<1x64xf32>
    %134 = tpu.matmul %131, %133, %cst_134 {dimension_numbers = #tpu.dot_dimension_numbers<[1], [0], [0], [1], [0, 0, 1, 1], [], []>} : vector<1x64xf32>, vector<64x64xf32>, vector<1x64xf32> -> vector<1x64xf32>
    %135 = arith.addf %130, %134 : vector<1x64xf32>
    %c0_135 = arith.constant 0 : index
    %c0_136 = arith.constant 0 : index
    %136 = vector.load %arg24[%c0_135, %c0_136] : memref<1x64xf32, #tpu.memory_space<vmem>>, vector<1x64xf32>
    %137 = arith.addf %135, %136 : vector<1x64xf32>
    %cst_137 = arith.constant 0.000000e+00 : f32
    %138 = vector.broadcast %cst_137 : f32 to vector<1x64xf32>
    %139 = arith.maximumf %137, %138 : vector<1x64xf32>
    %c0_138 = arith.constant 0 : index
    %c0_139 = arith.constant 0 : index
    %140 = vector.load %arg25[%c0_138, %c0_139] : memref<64x128xf32, #tpu.memory_space<vmem>>, vector<64x128xf32>
    %cst_140 = arith.constant dense<0.000000e+00> : vector<1x128xf32>
    %141 = tpu.matmul %139, %140, %cst_140 {dimension_numbers = #tpu.dot_dimension_numbers<[1], [0], [0], [1], [0, 0, 1, 1], [], []>} : vector<1x64xf32>, vector<64x128xf32>, vector<1x128xf32> -> vector<1x128xf32>
    %c0_141 = arith.constant 0 : index
    %c0_142 = arith.constant 0 : index
    %142 = vector.load %arg26[%c0_141, %c0_142] : memref<1x128xf32, #tpu.memory_space<vmem>>, vector<1x128xf32>
    %143 = arith.addf %141, %142 : vector<1x128xf32>
    %cst_143 = arith.constant 0.000000e+00 : f32
    %144 = vector.broadcast %cst_143 : f32 to vector<1x128xf32>
    %145 = arith.maximumf %143, %144 : vector<1x128xf32>
    %c0_144 = arith.constant 0 : index
    %c0_145 = arith.constant 0 : index
    %c0_146 = arith.constant 0 : index
    %146 = vector.load %arg27[%c0_144, %c0_145, %c0_146] : memref<1x1x128xf32, #tpu.memory_space<vmem>>, vector<1x1x128xf32>
    %147 = vector.shape_cast %146 : vector<1x1x128xf32> to vector<1x128xf32>
    %148 = vector.shape_cast %145 : vector<1x128xf32> to vector<1x1x128xf32>
    tpu.vector_store %arg27[%c0_144, %c0_145, %c0_146], %148 {strides = array<i32>} : memref<1x1x128xf32, #tpu.memory_space<vmem>>, vector<1x1x128xf32>,
    return
  }
  func.func @transform_0(%arg0: i32) -> (i32, i32) {
    %c0_i32 = arith.constant 0 : i32
    %c0_i32_0 = arith.constant 0 : i32
    return %arg0, %c0_i32 : i32, i32
  }
  func.func @transform_1(%arg0: i32) -> (i32, i32, i32) {
    %c0_i32 = arith.constant 0 : i32
    %c0_i32_0 = arith.constant 0 : i32
    %c0_i32_1 = arith.constant 0 : i32
    %c0_i32_2 = arith.constant 0 : i32
    return %c0_i32, %c0_i32_0, %c0_i32_1 : i32, i32, i32
  }
  func.func @transform_2(%arg0: i32) -> (i32, i32, i32) {
    %c0_i32 = arith.constant 0 : i32
    %c0_i32_0 = arith.constant 0 : i32
    %c0_i32_1 = arith.constant 0 : i32
    %c0_i32_2 = arith.constant 0 : i32
    return %c0_i32, %c0_i32_0, %c0_i32_1 : i32, i32, i32
  }
  func.func @transform_3(%arg0: i32) -> (i32, i32, i32) {
    %c0_i32 = arith.constant 0 : i32
    %c0_i32_0 = arith.constant 0 : i32
    %c0_i32_1 = arith.constant 0 : i32
    %c0_i32_2 = arith.constant 0 : i32
    return %c0_i32, %c0_i32_0, %c0_i32_1 : i32, i32, i32
  }
  func.func @transform_4(%arg0: i32) -> (i32, i32, i32) {
    %c0_i32 = arith.constant 0 : i32
    %c0_i32_0 = arith.constant 0 : i32
    %c0_i32_1 = arith.constant 0 : i32
    %c0_i32_2 = arith.constant 0 : i32
    return %c0_i32, %c0_i32_0, %c0_i32_1 : i32, i32, i32
  }
  func.func @transform_5(%arg0: i32) -> (i32, i32) {
    %c0_i32 = arith.constant 0 : i32
    %c0_i32_0 = arith.constant 0 : i32
    %c0_i32_1 = arith.constant 0 : i32
    return %c0_i32, %c0_i32_0 : i32, i32
  }
  func.func @transform_6(%arg0: i32) -> (i32, i32) {
    %c0_i32 = arith.constant 0 : i32
    %c0_i32_0 = arith.constant 0 : i32
    %c0_i32_1 = arith.constant 0 : i32
    return %c0_i32, %c0_i32_0 : i32, i32
  }
  func.func @transform_7(%arg0: i32) -> (i32, i32) {
    %c0_i32 = arith.constant 0 : i32
    %c0_i32_0 = arith.constant 0 : i32
    %c0_i32_1 = arith.constant 0 : i32
    return %c0_i32, %c0_i32_0 : i32, i32
  }
  func.func @transform_8(%arg0: i32) -> (i32, i32, i32) {
    %c0_i32 = arith.constant 0 : i32
    %c0_i32_0 = arith.constant 0 : i32
    %c0_i32_1 = arith.constant 0 : i32
    %c0_i32_2 = arith.constant 0 : i32
    return %c0_i32, %c0_i32_0, %c0_i32_1 : i32, i32, i32
  }
  func.func @transform_9(%arg0: i32) -> (i32, i32, i32) {
    %c0_i32 = arith.constant 0 : i32
    %c0_i32_0 = arith.constant 0 : i32
    %c0_i32_1 = arith.constant 0 : i32
    %c0_i32_2 = arith.constant 0 : i32
    return %c0_i32, %c0_i32_0, %c0_i32_1 : i32, i32, i32
  }
  func.func @transform_10(%arg0: i32) -> (i32, i32, i32) {
    %c0_i32 = arith.constant 0 : i32
    %c0_i32_0 = arith.constant 0 : i32
    %c0_i32_1 = arith.constant 0 : i32
    %c0_i32_2 = arith.constant 0 : i32
    return %c0_i32, %c0_i32_0, %c0_i32_1 : i32, i32, i32
  }
  func.func @transform_11(%arg0: i32) -> (i32, i32, i32) {
    %c0_i32 = arith.constant 0 : i32
    %c0_i32_0 = arith.constant 0 : i32
    %c0_i32_1 = arith.constant 0 : i32
    %c0_i32_2 = arith.constant 0 : i32
    return %c0_i32, %c0_i32_0, %c0_i32_1 : i32, i32, i32
  }
  func.func @transform_12(%arg0: i32) -> (i32, i32) {
    %c0_i32 = arith.constant 0 : i32
    %c0_i32_0 = arith.constant 0 : i32
    %c0_i32_1 = arith.constant 0 : i32
    return %c0_i32, %c0_i32_0 : i32, i32
  }
  func.func @transform_13(%arg0: i32) -> (i32, i32) {
    %c0_i32 = arith.constant 0 : i32
    %c0_i32_0 = arith.constant 0 : i32
    %c0_i32_1 = arith.constant 0 : i32
    return %c0_i32, %c0_i32_0 : i32, i32
  }
  func.func @transform_14(%arg0: i32) -> (i32, i32) {
    %c0_i32 = arith.constant 0 : i32
    %c0_i32_0 = arith.constant 0 : i32
    %c0_i32_1 = arith.constant 0 : i32
    return %c0_i32, %c0_i32_0 : i32, i32
  }
  func.func @transform_15(%arg0: i32) -> (i32, i32, i32) {
    %c0_i32 = arith.constant 0 : i32
    %c0_i32_0 = arith.constant 0 : i32
    %c0_i32_1 = arith.constant 0 : i32
    %c0_i32_2 = arith.constant 0 : i32
    return %c0_i32, %c0_i32_0, %c0_i32_1 : i32, i32, i32
  }
  func.func @transform_16(%arg0: i32) -> (i32, i32, i32) {
    %c0_i32 = arith.constant 0 : i32
    %c0_i32_0 = arith.constant 0 : i32
    %c0_i32_1 = arith.constant 0 : i32
    %c0_i32_2 = arith.constant 0 : i32
    return %c0_i32, %c0_i32_0, %c0_i32_1 : i32, i32, i32
  }
  func.func @transform_17(%arg0: i32) -> (i32, i32, i32) {
    %c0_i32 = arith.constant 0 : i32
    %c0_i32_0 = arith.constant 0 : i32
    %c0_i32_1 = arith.constant 0 : i32
    %c0_i32_2 = arith.constant 0 : i32
    return %c0_i32, %c0_i32_0, %c0_i32_1 : i32, i32, i32
  }
  func.func @transform_18(%arg0: i32) -> (i32, i32, i32) {
    %c0_i32 = arith.constant 0 : i32
    %c0_i32_0 = arith.constant 0 : i32
    %c0_i32_1 = arith.constant 0 : i32
    %c0_i32_2 = arith.constant 0 : i32
    return %c0_i32, %c0_i32_0, %c0_i32_1 : i32, i32, i32
  }
  func.func @transform_19(%arg0: i32) -> (i32, i32) {
    %c0_i32 = arith.constant 0 : i32
    %c0_i32_0 = arith.constant 0 : i32
    %c0_i32_1 = arith.constant 0 : i32
    return %c0_i32, %c0_i32_0 : i32, i32
  }
  func.func @transform_20(%arg0: i32) -> (i32, i32) {
    %c0_i32 = arith.constant 0 : i32
    %c0_i32_0 = arith.constant 0 : i32
    %c0_i32_1 = arith.constant 0 : i32
    return %c0_i32, %c0_i32_0 : i32, i32
  }
  func.func @transform_21(%arg0: i32) -> (i32, i32) {
    %c0_i32 = arith.constant 0 : i32
    %c0_i32_0 = arith.constant 0 : i32
    %c0_i32_1 = arith.constant 0 : i32
    return %c0_i32, %c0_i32_0 : i32, i32
  }
  func.func @transform_22(%arg0: i32) -> (i32, i32, i32) {
    %c0_i32 = arith.constant 0 : i32
    %c0_i32_0 = arith.constant 0 : i32
    %c0_i32_1 = arith.constant 0 : i32
    %c0_i32_2 = arith.constant 0 : i32
    return %c0_i32, %c0_i32_0, %c0_i32_1 : i32, i32, i32
  }
  func.func @transform_23(%arg0: i32) -> (i32, i32) {
    %c0_i32 = arith.constant 0 : i32
    %c0_i32_0 = arith.constant 0 : i32
    %c0_i32_1 = arith.constant 0 : i32
    return %c0_i32, %c0_i32_0 : i32, i32
  }
  func.func @transform_24(%arg0: i32) -> (i32, i32) {
    %c0_i32 = arith.constant 0 : i32
    %c0_i32_0 = arith.constant 0 : i32
    %c0_i32_1 = arith.constant 0 : i32
    return %c0_i32, %c0_i32_0 : i32, i32
  }
  func.func @transform_25(%arg0: i32) -> (i32, i32) {
    %c0_i32 = arith.constant 0 : i32
    %c0_i32_0 = arith.constant 0 : i32
    %c0_i32_1 = arith.constant 0 : i32
    return %c0_i32, %c0_i32_0 : i32, i32
  }
  func.func @transform_26(%arg0: i32) -> (i32, i32, i32) {
    %c0_i32 = arith.constant 0 : i32
    %c0_i32_0 = arith.constant 0 : i32
    %c0_i32_1 = arith.constant 0 : i32
    return %arg0, %c0_i32, %c0_i32_0 : i32, i32, i32
  }
}

</mosaic_0001>

<bundles_post_ra>
// kernel: _lambda_.1
= control target key start
LH: loop header
LB: loop body
LE: loop exit
PB: predicated region body
PF: predicated region fallthrough
CT: control target
= control target key end

     0   :  { %s5818_s0 = inlined_call_operand.vmem [shape: f32[32,64], index: 0, kind: input, shape index: {}]   ;;  %s5819_s1 = inlined_call_operand.vmem [shape: f32[3,64,128], index: 1, kind: input, shape index: {}]   ;;  %s5820_s2 = inlined_call_operand.vmem [shape: f32[2,16,16], index: 2, kind: input, shape index: {}]   ;;  %s5821_s3 = inlined_call_operand.vmem [shape: f32[2,128,64], index: 3, kind: input, shape index: {}]   ;;  %s5822_s4 = inlined_call_operand.vmem [shape: f32[2,8,16], index: 4, kind: input, shape index: {}]   ;;  %s5823_s5 = inlined_call_operand.vmem [shape: f32[1,128], index: 5, kind: input, shape index: {}]   ;;  %s5824_s6 = inlined_call_operand.vmem [shape: f32[1,128], index: 6, kind: input, shape index: {}]   ;;  %s5825_s7 = inlined_call_operand.vmem [shape: f32[1,128], index: 7, kind: input, shape index: {}]   ;;  %s5826_s8 = inlined_call_operand.vmem [shape: f32[3,64,128], index: 8, kind: input, shape index: {}]   ;;  %s5827_s9 = inlined_call_operand.vmem [shape: f32[2,8,8], index: 9, kind: input, shape index: {}]   ;;  %s5828_s10 = inlined_call_operand.vmem [shape: f32[2,128,64], index: 10, kind: input, shape index: {}]   ;;  %s5829_s11 = inlined_call_operand.vmem [shape: f32[2,4,8], index: 11, kind: input, shape index: {}]   ;;  %s5830_s12 = inlined_call_operand.vmem [shape: f32[1,128], index: 12, kind: input, shape index: {}]   ;;  %s5831_s13 = inlined_call_operand.vmem [shape: f32[1,128], index: 13, kind: input, shape index: {}]   ;;  %s5832_s14 = inlined_call_operand.vmem [shape: f32[1,128], index: 14, kind: input, shape index: {}]   ;;  %s5833_s15 = inlined_call_operand.vmem [shape: f32[3,64,128], index: 15, kind: input, shape index: {}]   ;;  %s5834_s16 = inlined_call_operand.vmem [shape: f32[2,4,4], index: 16, kind: input, shape index: {}]   ;;  %s5835_s17 = inlined_call_operand.vmem [shape: f32[2,128,64], index: 17, kind: input, shape index: {}]   ;;  %s5836_s18 = inlined_call_operand.vmem [shape: f32[2,2,4], index: 18, kind: input, shape index: {}]   ;;  %s5837_s19 = inlined_call_operand.vmem [shape: f32[1,128], index: 19, kind: input, shape index: {}]   ;;  %s5838_s20 = inlined_call_operand.vmem [shape: f32[1,128], index: 20, kind: input, shape index: {}]   ;;  %s5839_s21 = inlined_call_operand.vmem [shape: f32[1,128], index: 21, kind: input, shape index: {}]   ;;  %s5840_s22 = inlined_call_operand.vmem [shape: f32[2,64,64], index: 22, kind: input, shape index: {}]   ;;  %s5841_s23 = inlined_call_operand.vmem [shape: f32[1,64], index: 23, kind: input, shape index: {}]   ;;  %s5842_s24 = inlined_call_operand.vmem [shape: f32[64,128], index: 24, kind: input, shape index: {}]   ;;  %s5843_s25 = inlined_call_operand.vmem [shape: f32[1,128], index: 25, kind: input, shape index: {}]   ;;  %s5844_s26 = inlined_call_operand.hbm [shape: f32[2,1,128], index: 26, kind: output, shape index: {}]  }
   0x1   :  { %5864 = sst [smem:[#allocation11_spill]] %s5818_s0 }
   0x2   :  { %5865 = sst [smem:[#allocation12_spill]] %s5819_s1 }
   0x3   :  { %5866 = sst [smem:[#allocation13_spill]] %s5820_s2 }
   0x4   :  { %5867 = sst [smem:[#allocation14_spill]] %s5821_s3 }
   0x5   :  { %5868 = sst [smem:[#allocation15_spill]] %s5822_s4 }
   0x6   :  { %5869 = sst [smem:[#allocation16_spill]] %s5823_s5 }
   0x7   :  { %5870 = sst [smem:[#allocation17_spill]] %s5824_s6 }
   0x8   :  { %5871 = sst [smem:[#allocation18_spill]] %s5825_s7 }
   0x9   :  { %5872 = sst [smem:[#allocation19_spill]] %s5826_s8 }
   0xa   :  { %5873 = sst [smem:[#allocation20_spill]] %s5827_s9 }
   0xb   :  { %5874 = sst [smem:[#allocation21_spill]] %s5828_s10 }
   0xc   :  { %5875 = sst [smem:[#allocation22_spill]] %s5843_s25 }
   0xd   :  { %5876 = sst [smem:[#allocation23_spill]] %s5844_s26 }
   0xe   :  { %31 = vsyncpa [#allocation3], 0 }
   0xf   :  { %33 = vsyncpa [#allocation3 + $0x1], 0  ;;  %s4903_s27 = smov 0   ;;  %s4905_s3 = smov 0  }
  0x10   :  { %s4907_s7 = smov 0   ;;  %s4909_s28 = smov 0  }
  0x11 LB: > { %5877 = sst [smem:[#allocation5_spill]] %s4750_s27  ;;  %s4924_s8 = sadd.s32 4294967295, %s4762_s28   ;;  %s4762_s28 = sphi %s4909_s28, %s5902_s28   ;;  %s4758_s7 = sphi %s4907_s7, %s5904_s7   ;;  %s4754_s3 = sphi %s4905_s3, %s5906_s3   ;;  %s4750_s27 = sphi %s4903_s27, %s5905_s27  }
  0x12   : > { %5878 = sst [smem:[#allocation6_spill]] %s4758_s7  ;;  %s3411_s4 = sadd.s32 4294967294, %s4762_s28  }
  0x13   : > { %5879 = sst [smem:[#allocation7_spill]] %s4762_s28  ;;  %s4928_s29 = sadd.s32 1, %s4762_s28  }
  0x14   : > { %5880 = sst [smem:[#allocation8_spill]] %s4928_s29  ;;  %s597_s0 = sadd.s32 1, %s4758_s7 }
  0x15   : > { %s594_s9 = ssub.s32 %s4762_s28, %s4928_s29  ;;  %p607_p0 = scmp.ne.s32.totalorder %s4758_s7, %s4754_s3 }
  0x16   : > { %p595_p1 = scmp.eq.s32.totalorder %s594_s9, 0  ;;  %p608_p2 = scmp.eq.s32.totalorder %s4924_s8, 1 }
  0x17   : > { %p613_p3 = scmp.ne.s32.totalorder %s4754_s3, %s4750_s27  ;;  %p614_p4 = scmp.eq.s32.totalorder %s3411_s4, 1 }
  0x18   : > { %s4939_s30 = scalar_select %p595_p1, %s4758_s7, %s597_s0  }
  0x19   : > { %p4941_p5 = por %p608_p2, %p607_p0  ;;  %p4945_p6 = por %p614_p4, %p613_p3 }
  0x1a   : > { %5881 = sst [smem:[#allocation9_spill]] %s4939_s30  ;;  %p3414_p7 = scmp.ge.s32.totalorder %s4762_s28, 1 }
  0x1b   : > { %s5883_s5 = scalar_select %p4945_p6, 1, 0 }
  0x1c   : > { %p716_p8 = scmp.lt.s32.totalorder %s4762_s28, 3 }
  0x1d   : > { %5884 = sst [smem:[#allocation10_spill]] %s5883_s5 }
  0x1e   : > { %p717_p9 = pnand %p3414_p7, %p716_p8 }
  0x1f   : > { %s3415_s10 = sshll.u32 (!%p717_p9), %s4924_s8, 1  ;;  %s5885_s9 = sld [smem:[#allocation13_spill]] (!%p717_p9)  ;;  %vm804_vm0 = vcmask (!%p717_p9), 130048   ;;  %vm894_vm1 = vcmask (!%p717_p9), 523264   ;;  %vm4765_vm2 = vmmov (!%p717_p9), 0   ;;  %vm1607_vm3 = vcmask (!%p717_p9), 64512  }
  0x20   : > { %720 = sbr.rel (%p717_p9) target bundleno = 3601 (0xe11), region = 124  ;;  %p786_p10 = scmp.lt.s32.totalorder (!%p717_p9), %s3415_s10, 3  ;;  %vm2356_vm4 = vcmask (!%p717_p9), 1043456   ;;  %vm2352_vm5 = vcmask (!%p717_p9), 31744  }
  0x21   : > { %s5886_s30 = sld [smem:[#allocation12_spill]] (!%p717_p9)  ;;  %s5887_s5 = sld [smem:[#allocation11_spill]] (!%p717_p9) }
  0x22   : > { %s5889_s26 = sld [smem:[#allocation16_spill]] (!%p717_p9)  ;;  %s5890_s0 = sld [smem:[#allocation17_spill]] (!%p717_p9) }
  0x23   : > { %s5891_s29 = sld [smem:[#allocation18_spill]] (!%p717_p9)  ;;  %s5893_s28 = sld [smem:[#allocation15_spill]] (!%p717_p9) }
  0x24   : > { %s5895_s4 = sld [smem:[#allocation20_spill]] (!%p717_p9)  ;;  %s5897_s1 = sld [smem:[#allocation22_spill]] (!%p717_p9) }
  0x25   : > { %v802_v0 = vld [vmem:[%s5885_s9] sm:$0xff] (!%p717_p9)  ;;  %v803_v16 = vld [vmem:[%s5885_s9 + $0x8] sm:$0xff] (!%p717_p9)  ;;  %v3431_v17 = vld [vmem:[%s5885_s9 + $0x10] sm:$0xff] (!%p717_p9) }
  0x26   : > { %3822 = vmatprep.mubr.msk.f32.mxu0 (!%p717_p9), %vm804_vm0, %v802_v0  ;;  %v3432_v18 = vld [vmem:[%s5885_s9 + $0x18] sm:$0xff] (!%p717_p9) }
  0x27   : > { %v886_v1 = vld [vmem:[%s5886_s30] sm:$0xff]  ;;  %v887_v2 = vld [vmem:[%s5886_s30 + $0x8] sm:$0xff]  ;;  %v888_v4 = vld [vmem:[%s5886_s30 + $0x10] sm:$0xff]  ;;  %s5908_s10 = smov (!%p786_p10, %s3415_s10), 3 }
  0x28   : > { %v4328_v3 = vpack.c.bf16 %v887_v2, %v886_v1  ;;  %v889_v5 = vld [vmem:[%s5886_s30 + $0x18] sm:$0xff]  ;;  %v890_v7 = vld [vmem:[%s5886_s30 + $0x20] sm:$0xff]  ;;  %v891_v8 = vld [vmem:[%s5886_s30 + $0x28] sm:$0xff]  ;;  %s3416_s7 = sshll.u32 %s5908_s10, 3  ;;  %s5888_s10 = sld [smem:[#allocation14_spill]] }
  0x29   : > { %v4332_v6 = vpack.c.bf16 %v889_v5, %v888_v4  ;;  %s789_s25 = scalar_lea.vmem %s5887_s5, %s3416_s7  ;;  %v4336_v9 = vpack.c.bf16 %v891_v8, %v890_v7  ;;  %v892_v10 = vld [vmem:[%s5886_s30 + $0x30] sm:$0xff]  ;;  %v893_v13 = vld [vmem:[%s5886_s30 + $0x38] sm:$0xff]  ;;  %v3417_v19 = vld [vmem:[%s5886_s30 + $0x40] sm:$0xff]  ;;  %s5894_s6 = smov %s5893_s28 }
  0x2a   : > { %4329 = vmatprep.subr.bf16.mxu1 %v4328_v3  ;;  %v4980_v11 = vld [vmem:[%s789_s25] sm:$0xff]  ;;  %v4982_v12 = vld [vmem:[%s789_s25 + $0x8] sm:$0xff]  ;;  %v4340_v15 = vpack.c.bf16 %v893_v13, %v892_v10  ;;  %v3419_v40 = vld [vmem:[%s5886_s30 + $0x50] sm:$0xff]  ;;  %s5892_s25 = sld [smem:[#allocation19_spill]]  ;;  %s783_s5 = sand.u32 1, %s4754_s3  }
  0x2b   : > { %4331 = vmatpush3.bf16.msra.mxu1 %v4328_v3  ;;  %v4324_v14 = vpack.c.bf16 %v4982_v12, %v4980_v11  ;;  %v3418_v20 = vld [vmem:[%s5886_s30 + $0x48] sm:$0xff]  ;;  %v3420_v41 = vld [vmem:[%s5886_s30 + $0x58] sm:$0xff]  ;;  %v3421_v45 = vld [vmem:[%s5886_s30 + $0x60] sm:$0xff] }
  0x2c   : > { %4333 = vmatprep.subr.bf16.mxu1 %v4332_v6  ;;  %v4344_v21 = vpack.c.bf16 %v3418_v20, %v3417_v19  ;;  %v4348_v44 = vpack.c.bf16 %v3420_v41, %v3419_v40  ;;  %v3422_v46 = vld [vmem:[%s5886_s30 + $0x68] sm:$0xff]  ;;  %v3423_v50 = vld [vmem:[%s5886_s30 + $0x70] sm:$0xff]  ;;  %v3424_v51 = vld [vmem:[%s5886_s30 + $0x78] sm:$0xff] }
  0x2d   : > { %4325 = vmatprep.subr.bf16.mxu0 %v4324_v14  ;;  %v4352_v48 = vpack.c.bf16 %v3422_v46, %v3421_v45  ;;  %v4356_v52 = vpack.c.bf16 %v3424_v51, %v3423_v50  ;;  %v3435_v53 = vld [vmem:[%s5886_s30 + $0x80] sm:$0xff]  ;;  %v3436_v54 = vld [vmem:[%s5886_s30 + $0x88] sm:$0xff]  ;;  %v3437_v56 = vld [vmem:[%s5886_s30 + $0x90] sm:$0xff]  ;;  %v4766_v45 = vmov 0.0  }
  0x2e   : > { %4327 = vmatpush3.bf16.msra.mxu0 %v4324_v14  ;;  %v1262_v22 = vld [vmem:[%s5888_s10] sm:$0xff]  ;;  %v1263_v23 = vld [vmem:[%s5888_s10 + $0x8] sm:$0xff]  ;;  %v1264_v24 = vld [vmem:[%s5888_s10 + $0x10] sm:$0xff]  ;;  %v4364_v55 = vpack.c.bf16 %v3436_v54, %v3435_v53 }
  0x2f   : > { %4335 = vmatpush3.bf16.msra.mxu1 %v4332_v6  ;;  %4361 = vmatprep.subr.bf16.mxu0 %v4324_v14  ;;  %v4380_v25 = vpack.c.bf16 %v1263_v23, %v1262_v22  ;;  %v1265_v26 = vld [vmem:[%s5888_s10 + $0x18] sm:$0xff]  ;;  %v1266_v28 = vld [vmem:[%s5888_s10 + $0x20] sm:$0xff]  ;;  %v1267_v29 = vld [vmem:[%s5888_s10 + $0x28] sm:$0xff] }
  0x30   : > { %4337 = vmatprep.subr.bf16.mxu1 %v4336_v9  ;;  %v4384_v27 = vpack.c.bf16 %v1265_v26, %v1264_v24  ;;  %v4388_v30 = vpack.c.bf16 %v1267_v29, %v1266_v28  ;;  %v1268_v31 = vld [vmem:[%s5888_s10 + $0x30] sm:$0xff]  ;;  %v1269_v32 = vld [vmem:[%s5888_s10 + $0x38] sm:$0xff]  ;;  %v1270_v34 = vld [vmem:[%s5888_s10 + $0x40] sm:$0xff] }
  0x31   : > { %3823 = vmatmul.mubr.msk.f32.vlgmr.msra.gmra.mrb[0].mxu0 %vm804_vm0, %v803_v16  ;;  %v4392_v33 = vpack.c.bf16 %v1269_v32, %v1268_v31  ;;  %v1271_v35 = vld [vmem:[%s5888_s10 + $0x48] sm:$0xff]  ;;  %v1272_v37 = vld [vmem:[%s5888_s10 + $0x50] sm:$0xff]  ;;  %v1273_v38 = vld [vmem:[%s5888_s10 + $0x58] sm:$0xff] }
  0x32   : > { %4363 = vmatpush3.bf16.msra.mxu0 %v4324_v14  ;;  %3867 = vmatprep.mubr.msk.f32.mxu0 %vm804_vm0, %v3431_v17  ;;  %v4396_v36 = vpack.c.bf16 %v1271_v35, %v1270_v34  ;;  %v4400_v39 = vpack.c.bf16 %v1273_v38, %v1272_v37  ;;  %v3438_v57 = vld [vmem:[%s5886_s30 + $0x98] sm:$0xff]  ;;  %v3439_v59 = vld [vmem:[%s5886_s30 + $0xa0] sm:$0xff]  ;;  %v3440_v60 = vld [vmem:[%s5886_s30 + $0xa8] sm:$0xff] }
  0x33   : > { %4339 = vmatpush3.bf16.msra.mxu1 %v4336_v9  ;;  %4381 = vmatprep.subr.bf16.mxu0 %v4380_v25  ;;  %v4368_v58 = vpack.c.bf16 %v3438_v57, %v3437_v56  ;;  %v4372_v61 = vpack.c.bf16 %v3440_v60, %v3439_v59  ;;  %v3441_v62 = vld [vmem:[%s5886_s30 + $0xb0] sm:$0xff]  ;;  %v3442_v63 = vld [vmem:[%s5886_s30 + $0xb8] sm:$0xff]  ;;  %v1274_v1 = vld [vmem:[%s5888_s10 + $0x60] sm:$0xff] }
  0x34   : > { %4341 = vmatprep.subr.bf16.mxu1 %v4340_v15  ;;  %v4376_v0 = vpack.c.bf16 %v3442_v63, %v3441_v62  ;;  %v1275_v2 = vld [vmem:[%s5888_s10 + $0x68] sm:$0xff]  ;;  %v1276_v4 = vld [vmem:[%s5888_s10 + $0x70] sm:$0xff]  ;;  %v1277_v5 = vld [vmem:[%s5888_s10 + $0x78] sm:$0xff] }
  0x35   : > { %3868 = vmatmul.mubr.msk.f32.vlgmr.msra.gmra.mrb[2].mxu0 %vm804_vm0, %v3432_v18  ;;  %v4404_v3 = vpack.c.bf16 %v1275_v2, %v1274_v1  ;;  %v4408_v6 = vpack.c.bf16 %v1277_v5, %v1276_v4  ;;  %v3448_v7 = vld [vmem:[%s5888_s10 + $0x80] sm:$0xff]  ;;  %v3449_v8 = vld [vmem:[%s5888_s10 + $0x88] sm:$0xff]  ;;  %v3451_v22 = vld [vmem:[%s5888_s10 + $0x98] sm:$0xff] }
  0x36   : > { %4383 = vmatpush3.bf16.msra.mxu0 %v4380_v25  ;;  %v4412_v9 = vpack.c.bf16 %v3449_v8, %v3448_v7  ;;  %v3445_v10 = vld [vmem:[%s5889_s26] ss:$0 sm:$0xff]  ;;  %v3454_v29 = vld [vmem:[%s5888_s10 + $0xb0] sm:$0xff]  ;;  %v3468_v53 = vld [vmem:[%s5892_s25 + $0x48] sm:$0xff] }
  0x37   : > { %4343 = vmatpush3.bf16.msra.mxu1 %v4340_v15  ;;  %4385 = vmatprep.subr.bf16.mxu0 %v4384_v27  ;;  %v3446_v14 = vld [vmem:[%s5890_s0] ss:$0 sm:$0xff]  ;;  %v3458_v35 = vld [vmem:[%s5888_s10 + $0xd0] sm:$0xff]  ;;  %v3465_v56 = vld [vmem:[%s5894_s6 + $0x8] sm:$0xff]  ;;  %s5896_s0 = sld [smem:[#allocation21_spill]]  ;;  %s784_s6 = scalar_lea.vmem [#allocation2], %s783_s5 }
  0x38   : > { %4345 = vmatprep.subr.bf16.mxu1 %v4344_v21  ;;  %v3447_v19 = vld [vmem:[%s5891_s29] ss:$0 sm:$0xff]  ;;  %v3462_v41 = vld [vmem:[%s5888_s10 + $0xf0] sm:$0xff]  ;;  %v3470_v59 = vld [vmem:[%s5892_s25 + $0x58] sm:$0xff]  ;;  %s3356_s7 = sshll.u32 %s784_s6, 4  ;;  %s5778_s7 = int_to_ptr.vmem [resolvable:$true] %s3356_s7 }
  0x39   : > { %v3452_v26 = vld [vmem:[%s5888_s10 + $0xa0] sm:$0xff]  ;;  %v3472_v62 = vld [vmem:[%s5892_s25 + $0x68] sm:$0xff]  ;;  %v3474_v1 = vld [vmem:[%s5892_s25 + $0x78] sm:$0xff]  ;;  %s4700_s26 = scalar_lea.vmem %s5778_s7, 16 }
  0x3a   : > { %4387 = vmatpush3.bf16.msra.mxu0 %v4384_v27  ;;  %v3453_v27 = vld [vmem:[%s5888_s10 + $0xa8] sm:$0xff]  ;;  %v3456_v32 = vld [vmem:[%s5888_s10 + $0xc0] sm:$0xff]  ;;  %p4701_p11 = scmp.ne.s32.totalorder %s5778_s7, %s4700_s26 }
  0x3b   : > { %4389 = vmatprep.subr.bf16.mxu0 %v4388_v30  ;;  %v4420_v28 = vpack.c.bf16 %v3453_v27, %v3452_v26  ;;  %v3460_v38 = vld [vmem:[%s5888_s10 + $0xe0] sm:$0xff]  ;;  %v1682_v4 = vld [vmem:[%s5892_s25 + $0x8] sm:$0xff] }
  0x3c   : > { %v3478_v27 = vld [vmem:[%s5895_s4 + $0x8] sm:$0xff]  ;;  %p4702_p12 = pnand %p4701_p11, %p4941_p5 }
  0x3e   : > { %4391 = vmatpush3.bf16.msra.mxu0 %v4388_v30  ;;  %v3455_v30 = vld [vmem:[%s5888_s10 + $0xb8] sm:$0xff]  ;;  %p4703_p13 = pneg %p4702_p12 }
  0x3f   : > { %4393 = vmatprep.subr.bf16.mxu0 %v4392_v33  ;;  %v4424_v31 = vpack.c.bf16 %v3455_v30, %v3454_v29  ;;  %v3482_v29 = vld [vmem:[%s5892_s25 + $0x90] sm:$0xff]  ;;  %v3483_v30 = vld [vmem:[%s5892_s25 + $0x98] sm:$0xff] }
  0x42   : > { %4395 = vmatpush3.bf16.msra.mxu0 %v4392_v33  ;;  %v3457_v33 = vld [vmem:[%s5888_s10 + $0xc8] sm:$0xff] }
  0x43   : > { %4397 = vmatprep.subr.bf16.mxu0 %v4396_v36  ;;  %v4428_v34 = vpack.c.bf16 %v3457_v33, %v3456_v32  ;;  %v3484_v32 = vld [vmem:[%s5892_s25 + $0xa0] sm:$0xff]  ;;  %v3485_v33 = vld [vmem:[%s5892_s25 + $0xa8] sm:$0xff] }
  0x46   : > { %4399 = vmatpush3.bf16.msra.mxu0 %v4396_v36  ;;  %v3459_v36 = vld [vmem:[%s5888_s10 + $0xd8] sm:$0xff] }
  0x47   : > { %4401 = vmatprep.subr.bf16.mxu0 %v4400_v39  ;;  %v4432_v37 = vpack.c.bf16 %v3459_v36, %v3458_v35  ;;  %v3486_v35 = vld [vmem:[%s5892_s25 + $0xb0] sm:$0xff]  ;;  %v3487_v36 = vld [vmem:[%s5892_s25 + $0xb8] sm:$0xff] }
  0x4a   : > { %4403 = vmatpush3.bf16.msra.mxu0 %v4400_v39  ;;  %v3461_v39 = vld [vmem:[%s5888_s10 + $0xe8] sm:$0xff] }
  0x4b   : > { %4405 = vmatprep.subr.bf16.mxu0 %v4404_v3  ;;  %v4436_v40 = vpack.c.bf16 %v3461_v39, %v3460_v38  ;;  %v2018_v38 = vld [vmem:[%s5896_s0] sm:$0xff]  ;;  %v2019_v39 = vld [vmem:[%s5896_s0 + $0x8] sm:$0xff] }
  0x4e   : > { %4407 = vmatpush3.bf16.msra.mxu0 %v4404_v3  ;;  %v1681_v3 = vld [vmem:[%s5892_s25] sm:$0xff] }
  0x4f   : > { %4409 = vmatprep.subr.bf16.mxu0 %v4408_v6 }
  0x52   : > { %4411 = vmatpush3.bf16.msra.mxu0 %v4408_v6 }
  0x53   : > { %4413 = vmatprep.subr.bf16.mxu0 %v4412_v9 }
 0x104   : > { %v3824_v42 = vpop.f32.mrb[0].mxu0 }
 0x105   : > { %v877_v43 = vpop.f32.mrb[1].mxu0 }
 0x106   : > { %3841 = vmatprep.mubr.msk.f32.mxu1 %vm894_vm1, %v877_v43 }
 0x107   : > { %3842 = vmatmul.mubr.msk.f32.vlgmr.msra.gmra.mrb[0].mxu1 %vm894_vm1, %v3824_v42  ;;  %v3463_v42 = vld [vmem:[%s5888_s10 + $0xf8] sm:$0xff] }
 0x108   : > { %4347 = vmatpush3.bf16.msra.mxu1 %v4344_v21  ;;  %3860 = vmatprep.mubr.msk.f32.mxu1 %vm894_vm1, %v4980_v11  ;;  %v3869_v47 = vpop.f32.mrb[2].mxu0  ;;  %v3450_v21 = vld [vmem:[%s5888_s10 + $0x90] sm:$0xff]  ;;  %v4440_v43 = vpack.c.bf16 %v3463_v42, %v3462_v41  ;;  %v2021_v42 = vld [vmem:[%s5896_s0 + $0x18] sm:$0xff] }
 0x109   : > { %4349 = vmatprep.subr.bf16.mxu1 %v4348_v44  ;;  %v1132_v49 = vpop.f32.mrb[3].mxu0  ;;  %v4416_v25 = vpack.c.bf16 %v3451_v22, %v3450_v21  ;;  %v3480_v22 = vld [vmem:[%s5892_s25 + $0x80] sm:$0xff]  ;;  %v2020_v41 = vld [vmem:[%s5896_s0 + $0x10] sm:$0xff] }
 0x10c   : > { %4351 = vmatpush3.bf16.msra.mxu1 %v4348_v44  ;;  %v4764_v44 = vmov 0.0|0.0  }
 0x10d   : > { %4353 = vmatprep.subr.bf16.mxu1 %v4352_v48 }
 0x110   : > { %4355 = vmatpush3.bf16.msra.mxu1 %v4352_v48 }
 0x111   : > { %4357 = vmatprep.subr.bf16.mxu1 %v4356_v52 }
 0x114   : > { %4359 = vmatpush3.bf16.msra.mxu1 %v4356_v52  ;;  %v3467_v52 = vld [vmem:[%s5892_s25 + $0x40] sm:$0xff] }
 0x115   : > { %4365 = vmatprep.subr.bf16.mxu1 %v4364_v55  ;;  %v4463_v57 = vpack.c.bf16 %v3468_v53, %v3467_v52  ;;  %v2026_v52 = vld [vmem:[%s5896_s0 + $0x40] sm:$0xff]  ;;  %v2027_v53 = vld [vmem:[%s5896_s0 + $0x48] sm:$0xff] }
 0x117   : > { %3861 = vmatmul.mubr.msk.f32.vlgmr.msra.gmra.mrb[0].mxu1 %vm894_vm1, %v4982_v12 }
 0x118   : > { %4367 = vmatpush3.bf16.msra.mxu1 %v4364_v55  ;;  %3886 = vmatprep.mubr.msk.f32.mxu1 %vm894_vm1, %v1132_v49  ;;  %v1447_v55 = vld [vmem:[%s5893_s28] sm:$0xff]  ;;  %s3344_s28 = scalar_lea.sflag [#allocation3], %s783_s5 }
 0x119   : > { %4369 = vmatprep.subr.bf16.mxu1 %v4368_v58 }
 0x11c   : > { %4371 = vmatpush3.bf16.msra.mxu1 %v4368_v58  ;;  %v3469_v58 = vld [vmem:[%s5892_s25 + $0x50] sm:$0xff] }
 0x11d   : > { %4373 = vmatprep.subr.bf16.mxu1 %v4372_v61  ;;  %v4466_v60 = vpack.c.bf16 %v3470_v59, %v3469_v58 }
 0x120   : > { %4375 = vmatpush3.bf16.msra.mxu1 %v4372_v61  ;;  %v3471_v61 = vld [vmem:[%s5892_s25 + $0x60] sm:$0xff] }
 0x121   : > { %4377 = vmatprep.subr.bf16.mxu1 %v4376_v0  ;;  %v4469_v63 = vpack.c.bf16 %v3472_v62, %v3471_v61  ;;  %v3494_v61 = vld [vmem:[%s5896_s0 + $0x90] sm:$0xff]  ;;  %v3495_v62 = vld [vmem:[%s5896_s0 + $0x98] sm:$0xff] }
 0x124   : > { %4379 = vmatpush3.bf16.msra.mxu1 %v4376_v0  ;;  %v3473_v0 = vld [vmem:[%s5892_s25 + $0x70] sm:$0xff] }
 0x125   : > { %4447 = vmatprep.subr.bf16.mxu1 %v4764_v44  ;;  %v4472_v2 = vpack.c.bf16 %v3474_v1, %v3473_v0  ;;  %v4514_v1 = vpack.c.bf16 %v3495_v62, %v3494_v61  ;;  %v3511_v62 = vld [vmem:[%s5833_s15 + $0x40] sm:$0xff] }
 0x127   : > { %3887 = vmatmul.mubr.msk.f32.vlgmr.msra.gmra.mrb[0].mxu1 %vm894_vm1, %v3869_v47 }
 0x128   : > { %3970 = vmatprep.mubr.msk.f32.mxu1 %vm4765_vm2, %v4766_v45 }
 0x1fa   : > { %v3888_v11 = vpop.f32.mrb[0].mxu1 }
 0x1fb   : > { %v1241_v12 = vadd.f32 %v3888_v11, %v3445_v10  ;;  %v1222_v13 = vpop.f32.mrb[1].mxu1  ;;  %v4451_v11 = vpack.c.bf16 %v1682_v4, %v1681_v3  ;;  %v3497_v3 = vld [vmem:[%s5896_s0 + $0xa8] sm:$0xff] }
 0x1fc   : > { %v1240_v15 = vadd.f32 %v3445_v10, %v1222_v13  ;;  %v1606_v10 = vld [vmem:[%s5895_s4] sm:$0xff]  ;;  %v1684_v13 = vld [vmem:[%s5892_s25 + $0x18] sm:$0xff]  ;;  %s3570_s4 = sshll.u32 %s4924_s8, 4  ;;  %s4767_s8 = smov [#allocation2]  }
 0x1fd   : > { %v1243_v16 = vmax.f32 %v1241_v12, 0.0  ;;  %v1683_v12 = vld [vmem:[%s5892_s25 + $0x10] sm:$0xff] }
 0x1fe   : > { %v1242_v17 = vmax.f32 %v1240_v15, 0.0  ;;  %v1685_v15 = vld [vmem:[%s5892_s25 + $0x20] sm:$0xff] }
 0x1ff   : > { %v1252_v18 = vmul.f32 %v3446_v14, %v1243_v16  ;;  %v1686_v16 = vld [vmem:[%s5892_s25 + $0x28] sm:$0xff] }
 0x200   : > { %v1251_v20 = vmul.f32 %v3446_v14, %v1242_v17  ;;  %v4454_v14 = vpack.c.bf16 %v1684_v13, %v1683_v12  ;;  %v4457_v17 = vpack.c.bf16 %v1686_v16, %v1685_v15  ;;  %v2029_v12 = vld [vmem:[%s5896_s0 + $0x58] sm:$0xff]  ;;  %v3502_v13 = vld [vmem:[%s5896_s0 + $0xd0] sm:$0xff] }
 0x201   : > { %v1261_v24 = vadd.f32 %v3447_v19, %v1252_v18  ;;  %v1687_v18 = vld [vmem:[%s5892_s25 + $0x30] sm:$0xff]  ;;  %v3503_v15 = vld [vmem:[%s5896_s0 + $0xd8] sm:$0xff] }
 0x202   : > { %v1260_v23 = vadd.f32 %v3447_v19, %v1251_v20  ;;  %v1688_v19 = vld [vmem:[%s5892_s25 + $0x38] sm:$0xff]  ;;  %v4526_v16 = vpack.c.bf16 %v3503_v15, %v3502_v13  ;;  %v3527_v15 = vld [vmem:[%s5833_s15 + $0x88] sm:$0xff] }
 0x203   : > { %v4460_v20 = vpack.c.bf16 %v1688_v19, %v1687_v18  ;;  %v2031_v18 = vld [vmem:[%s5896_s0 + $0x68] sm:$0xff]  ;;  %v3504_v19 = vld [vmem:[%s5896_s0 + $0xe0] sm:$0xff] }
 0x204   : > { %3921 = vmatprep.mubr.f32.mxu0 %v1260_v23 }
 0x205   : > { %3922 = vmatmul.mubr.f32.vlgmr.msra.gmra.mrb[4].mxu0 %v1261_v24 }
 0x206   : > { %4415 = vmatpush3.bf16.msra.mxu0 %v4412_v9  ;;  %3956 = vmatprep.mubr.f32.mxu0 %v1260_v23  ;;  %v3481_v23 = vld [vmem:[%s5892_s25 + $0x88] sm:$0xff] }
 0x207   : > { %4417 = vmatprep.subr.bf16.mxu0 %v4416_v25 }
 0x20a   : > { %4419 = vmatpush3.bf16.msra.mxu0 %v4416_v25 }
 0x20b   : > { %4421 = vmatprep.subr.bf16.mxu0 %v4420_v28 }
 0x20e   : > { %4423 = vmatpush3.bf16.msra.mxu0 %v4420_v28  ;;  %v4475_v28 = vpack.c.bf16 %v3481_v23, %v3480_v22  ;;  %v2032_v23 = vld [vmem:[%s5896_s0 + $0x70] sm:$0xff] }
 0x20f   : > { %4425 = vmatprep.subr.bf16.mxu0 %v4424_v31 }
 0x212   : > { %4427 = vmatpush3.bf16.msra.mxu0 %v4424_v31  ;;  %v4478_v31 = vpack.c.bf16 %v3483_v30, %v3482_v29  ;;  %v3489_v30 = vld [vmem:[%s5830_s12] ss:$0 sm:$0xff] }
 0x213   : > { %4429 = vmatprep.subr.bf16.mxu0 %v4428_v34 }
 0x216   : > { %4431 = vmatpush3.bf16.msra.mxu0 %v4428_v34  ;;  %v4481_v34 = vpack.c.bf16 %v3485_v33, %v3484_v32 }
 0x217   : > { %4433 = vmatprep.subr.bf16.mxu0 %v4432_v37 }
 0x21a   : > { %4435 = vmatpush3.bf16.msra.mxu0 %v4432_v37  ;;  %v4484_v37 = vpack.c.bf16 %v3487_v36, %v3486_v35  ;;  %v3491_v36 = vld [vmem:[%s5832_s14] ss:$0 sm:$0xff] }
 0x21b   : > { %4437 = vmatprep.subr.bf16.mxu0 %v4436_v40 }
 0x21e   : > { %4439 = vmatpush3.bf16.msra.mxu0 %v4436_v40  ;;  %v4487_v40 = vpack.c.bf16 %v2019_v39, %v2018_v38 }
 0x21f   : > { %4441 = vmatprep.subr.bf16.mxu0 %v4440_v43 }
 0x222   : > { %4443 = vmatpush3.bf16.msra.mxu0 %v4440_v43  ;;  %v4490_v43 = vpack.c.bf16 %v2021_v42, %v2020_v41 }
 0x223   : > { %4444 = vmatprep.subr.bf16.mxu0 %v4764_v44 }
 0x225   : > { %3957 = vmatmul.mubr.f32.vlgmr.msra.gmra.mrb[6].mxu0 %v1261_v24 }
 0x226   : > { %3963 = vmatprep.mubr.msk.f32.mxu0 %vm4765_vm2, %v4766_v45 }
 0x2d8   : > { %v3923_v46 = vpop.f32.mrb[4].mxu0 }
 0x2d9   : > { %v1344_v47 = vpop.f32.mrb[5].mxu0 }
 0x2f8   : > { %v3958_v48 = vpop.f32.mrb[6].mxu0 }
 0x2f9   : > { %v1446_v49 = vmax.f32 %v3923_v46, %v3958_v48  ;;  %v1436_v50 = vpop.f32.mrb[7].mxu0  ;;  %v2022_v46 = vld [vmem:[%s5896_s0 + $0x20] sm:$0xff] }
 0x2fa   : > { %v1445_v51 = vmax.f32 %v1344_v47, %v1436_v50  ;;  %v2023_v47 = vld [vmem:[%s5896_s0 + $0x28] sm:$0xff]  ;;  %v2025_v50 = vld [vmem:[%s5896_s0 + $0x38] sm:$0xff] }
 0x2fb   : > { %v4493_v48 = vpack.c.bf16 %v2023_v47, %v2022_v46  ;;  %v2192_v46 = vld [vmem:[%s5829_s11] sm:$0xf]  ;;  %v3509_v47 = vld [vmem:[%s5829_s11 + $0x4] sm:$0xf] }
 0x2fc   : > { %v4445_v54 = vpack.c.bf16 %v1446_v49, %v1445_v51  ;;  %v2024_v49 = vld [vmem:[%s5896_s0 + $0x30] sm:$0xff] }
 0x2fd   : > { %v4496_v51 = vpack.c.bf16 %v2025_v50, %v2024_v49  ;;  %v2431_v49 = vld [vmem:[%s5833_s15 + $0x8] sm:$0xff]  ;;  %v2432_v50 = vld [vmem:[%s5833_s15 + $0x10] sm:$0xff] }
 0x2fe   : > { %4446 = vmatpush3.bf16.msra.mxu0 %v4445_v54  ;;  %4449 = vmatpush3.bf16.msra.mxu1 %v4445_v54  ;;  %v4499_v54 = vpack.c.bf16 %v2027_v53, %v2026_v52  ;;  %v2433_v52 = vld [vmem:[%s5833_s15 + $0x18] sm:$0xff] }
 0x2ff   : > { %4462 = vmatprep.subr.bf16.mxu0 %v4764_v44  ;;  %3973 = vmatprep.subr.mxu1 %v4766_v45  ;;  %v4538_v53 = vpack.c.bf16 %v2433_v52, %v2432_v50 }
 0x301   : > { %3964 = vmatmul.mubr.msk.f32.vlgmr.msra.gmra.mrb[8].mxu0 %vm804_vm0, %v1447_v55  ;;  %3971 = vmatmul.mubr.msk.f32.vlgmr.msra.gmra.mrb[2].mxu1 %vm804_vm0, %v3465_v56  ;;  %v3492_v55 = vld [vmem:[%s5896_s0 + $0x80] sm:$0xff]  ;;  %v3493_v56 = vld [vmem:[%s5896_s0 + $0x88] sm:$0xff] }
 0x302   : > { %4464 = vmatpush3.bf16.msra.mxu0 %v4463_v57  ;;  %4013 = vmatprep.mubr.msk.f32.mxu0 %vm4765_vm2, %v4766_v45 }
 0x303   : > { %4465 = vmatprep.subr.bf16.mxu0 %v4764_v44  ;;  %3975 = vmatprep.mubr.msk.f32.mxu1 %vm4765_vm2, %v4766_v45 }
 0x306   : > { %4467 = vmatpush3.bf16.msra.mxu0 %v4466_v60  ;;  %v4511_v60 = vpack.c.bf16 %v3493_v56, %v3492_v55  ;;  %v2435_v55 = vld [vmem:[%s5833_s15 + $0x28] sm:$0xff] }
 0x307   : > { %4468 = vmatprep.subr.bf16.mxu0 %v4764_v44 }
 0x30a   : > { %4470 = vmatpush3.bf16.msra.mxu0 %v4469_v63 }
 0x30b   : > { %4471 = vmatprep.subr.bf16.mxu0 %v4764_v44 }
 0x30e   : > { %4473 = vmatpush3.bf16.msra.mxu0 %v4472_v2  ;;  %v3496_v2 = vld [vmem:[%s5896_s0 + $0xa0] sm:$0xff] }
 0x30f   : > { %4486 = vmatprep.subr.bf16.mxu0 %v4764_v44  ;;  %v4517_v4 = vpack.c.bf16 %v3497_v3, %v3496_v2  ;;  %v2351_v3 = vld [vmem:[%s5834_s16] sm:$0xf] }
 0x3d4   : > { %v1517_v5 = vpop.f32.mrb[8].mxu0  ;;  %v1592_v6 = vpop.f32.mrb[2].mxu1 }
 0x3d5   : > { %v1596_v7 = vmax.f32 %v1517_v5, %v1592_v6  ;;  %v3965_v8 = vpop.f32.mrb[9].mxu0  ;;  %v3972_v9 = vpop.f32.mrb[3].mxu1  ;;  %v3498_v5 = vld [vmem:[%s5896_s0 + $0xb0] sm:$0xff]  ;;  %v3499_v6 = vld [vmem:[%s5896_s0 + $0xb8] sm:$0xff] }
 0x3d6   : > { %v3500_v8 = vld [vmem:[%s5896_s0 + $0xc0] sm:$0xff]  ;;  %v3501_v9 = vld [vmem:[%s5896_s0 + $0xc8] sm:$0xff] }
 0x3d7   : > { %3974 = vmatpush3.msra.mxu1 %v1596_v7  ;;  %4014 = vmatmul.mubr.msk.f32.vlgmr.msra.gmra.mrb[10].mxu0 %vm894_vm1, %v1596_v7 }
 0x3d8   : > { %3976 = vmatmul.mubr.msk.f32.vlgmr.msra.gmra.mrb[4].mxu1 %vm1607_vm3, %v1606_v10  ;;  %4450 = vmatprep.subr.bf16.mxu1 %v4764_v44  ;;  %v4523_v10 = vpack.c.bf16 %v3501_v9, %v3500_v8  ;;  %v3515_v8 = vld [vmem:[%s5833_s15 + $0x60] sm:$0xff]  ;;  %v3516_v9 = vld [vmem:[%s5833_s15 + $0x68] sm:$0xff] }
 0x3d9   : > { %4452 = vmatpush3.bf16.msra.mxu1 %v4451_v11  ;;  %3994 = vmatprep.mubr.msk.f32.mxu1 %vm4765_vm2, %v4766_v45  ;;  %v2028_v11 = vld [vmem:[%s5896_s0 + $0x50] sm:$0xff] }
 0x3da   : > { %4453 = vmatprep.subr.bf16.mxu1 %v4764_v44  ;;  %4072 = vmatprep.mubr.msk.f32.mxu0 %vm4765_vm2, %v4766_v45 }
 0x3db   : > { %4488 = vmatpush3.bf16.msra.mxu0 %v4487_v40 }
 0x3dc   : > { %4489 = vmatprep.subr.bf16.mxu0 %v4764_v44 }
 0x3dd   : > { %4455 = vmatpush3.bf16.msra.mxu1 %v4454_v14  ;;  %v4502_v14 = vpack.c.bf16 %v2029_v12, %v2028_v11  ;;  %v3517_v11 = vld [vmem:[%s5833_s15 + $0x70] sm:$0xff]  ;;  %v3518_v12 = vld [vmem:[%s5833_s15 + $0x78] sm:$0xff] }
 0x3de   : > { %4456 = vmatprep.subr.bf16.mxu1 %v4764_v44  ;;  %v4556_v13 = vpack.c.bf16 %v3518_v12, %v3517_v11  ;;  %v2779_v11 = vld [vmem:[%s5835_s17 + $0x68] sm:$0xff]  ;;  %v3550_v12 = vld [vmem:[%s5835_s17 + $0xe0] sm:$0xff] }
 0x3df   : > { %4491 = vmatpush3.bf16.msra.mxu0 %v4490_v43 }
 0x3e0   : > { %4492 = vmatprep.subr.bf16.mxu0 %v4764_v44 }
 0x3e1   : > { %4458 = vmatpush3.bf16.msra.mxu1 %v4457_v17  ;;  %v2030_v17 = vld [vmem:[%s5896_s0 + $0x60] sm:$0xff] }
 0x3e2   : > { %4459 = vmatprep.subr.bf16.mxu1 %v4764_v44 }
 0x3e3   : > { %4494 = vmatpush3.bf16.msra.mxu0 %v4493_v48  ;;  %v2430_v48 = vld [vmem:[%s5833_s15] sm:$0xff] }
 0x3e4   : > { %4495 = vmatprep.subr.bf16.mxu0 %v4764_v44 }
 0x3e5   : > { %4461 = vmatpush3.bf16.msra.mxu1 %v4460_v20  ;;  %v4505_v20 = vpack.c.bf16 %v2031_v18, %v2030_v17  ;;  %v3529_v18 = vld [vmem:[%s5833_s15 + $0x98] sm:$0xff] }
 0x3e6   : > { %4016 = vmatprep.subr.mxu1 %v4766_v45 }
 0x3e7   : > { %4497 = vmatpush3.bf16.msra.mxu0 %v4496_v51  ;;  %v4535_v51 = vpack.c.bf16 %v2431_v49, %v2430_v48  ;;  %v3538_v48 = vld [vmem:[%s5835_s17 + $0x80] sm:$0xff]  ;;  %v3539_v49 = vld [vmem:[%s5835_s17 + $0x88] sm:$0xff] }
 0x3e8   : > { %4498 = vmatprep.subr.bf16.mxu0 %v4764_v44 }
 0x3eb   : > { %4500 = vmatpush3.bf16.msra.mxu0 %v4499_v54  ;;  %v2434_v54 = vld [vmem:[%s5833_s15 + $0x20] sm:$0xff] }
 0x3ec   : > { %4501 = vmatprep.subr.bf16.mxu0 %v4764_v44  ;;  %v4541_v56 = vpack.c.bf16 %v2435_v55, %v2434_v54  ;;  %v3540_v54 = vld [vmem:[%s5835_s17 + $0x90] sm:$0xff]  ;;  %v3541_v55 = vld [vmem:[%s5835_s17 + $0x98] sm:$0xff] }
 0x3ef   : > { %4503 = vmatpush3.bf16.msra.mxu0 %v4502_v14  ;;  %v3526_v14 = vld [vmem:[%s5833_s15 + $0x80] sm:$0xff] }
 0x3f0   : > { %4504 = vmatprep.subr.bf16.mxu0 %v4764_v44  ;;  %v4559_v17 = vpack.c.bf16 %v3527_v15, %v3526_v14  ;;  %v3551_v14 = vld [vmem:[%s5835_s17 + $0xe8] sm:$0xff] }
 0x3f1   : > { %v4613_v15 = vpack.c.bf16 %v3551_v14, %v3550_v12  ;;  %v3264_v14 = vld [vmem:[%s5842_s24 + $0x28] sm:$0xff] }
 0x3f3   : > { %4506 = vmatpush3.bf16.msra.mxu0 %v4505_v20  ;;  %v3530_v20 = vld [vmem:[%s5833_s15 + $0xa0] sm:$0xff] }
 0x3f4   : > { %4507 = vmatprep.subr.bf16.mxu0 %v4764_v44 }
 0x4aa   : > { %v1831_v21 = vpop.f32.mrb[10].mxu0 }
 0x4ab   : > { %v1677_v24 = vpop.f32.mrb[4].mxu1  ;;  %v4015_v25 = vpop.f32.mrb[11].mxu0 }
 0x4ac   : > { %v3977_v26 = vpop.f32.mrb[5].mxu1  ;;  %3995 = vmatmul.mubr.msk.f32.vlgmr.msra.gmra.mrb[6].mxu1 %vm894_vm1, %v1677_v24  ;;  %v2033_v24 = vld [vmem:[%s5896_s0 + $0x78] sm:$0xff]  ;;  %v3506_v25 = vld [vmem:[%s5896_s0 + $0xf0] sm:$0xff] }
 0x4ad   : > { %4017 = vmatpush3.msra.mxu1 %v1596_v7  ;;  %4018 = vmatprep.mubr.msk.f32.mxu1 %vm4765_vm2, %v4766_v45  ;;  %v4520_v7 = vpack.c.bf16 %v3499_v6, %v3498_v5  ;;  %v4508_v26 = vpack.c.bf16 %v2033_v24, %v2032_v23  ;;  %v3513_v5 = vld [vmem:[%s5833_s15 + $0x50] sm:$0xff]  ;;  %v3514_v6 = vld [vmem:[%s5833_s15 + $0x58] sm:$0xff] }
 0x4ae   : > { %4474 = vmatprep.subr.bf16.mxu1 %v4764_v44 }
 0x4af   : > { %4509 = vmatpush3.bf16.msra.mxu0 %v4508_v26 }
 0x4b0   : > { %4019 = vmatmul.mubr.msk.f32.vlgmr.msra.gmra.mrb[8].mxu1 %vm1607_vm3, %v3478_v27  ;;  %v3507_v27 = vld [vmem:[%s5896_s0 + $0xf8] sm:$0xff]  ;;  %4110 = vmatprep.subr.mxu0 %v4766_v45 }
 0x4b1   : > { %4476 = vmatpush3.bf16.msra.mxu1 %v4475_v28  ;;  %4037 = vmatprep.mubr.msk.f32.mxu1 %vm4765_vm2, %v4766_v45  ;;  %v4532_v28 = vpack.c.bf16 %v3507_v27, %v3506_v25  ;;  %v3523_v25 = vld [vmem:[%s5834_s16 + $0x4] sm:$0xf] }
 0x4b2   : > { %4477 = vmatprep.subr.bf16.mxu1 %v4764_v44 }
 0x4b5   : > { %4479 = vmatpush3.bf16.msra.mxu1 %v4478_v31 }
 0x4b6   : > { %4480 = vmatprep.subr.bf16.mxu1 %v4764_v44 }
 0x4b9   : > { %4482 = vmatpush3.bf16.msra.mxu1 %v4481_v34  ;;  %v3490_v34 = vld [vmem:[%s5831_s13] ss:$0 sm:$0xff] }
 0x4ba   : > { %4483 = vmatprep.subr.bf16.mxu1 %v4764_v44 }
 0x4bd   : > { %4485 = vmatpush3.bf16.msra.mxu1 %v4484_v37 }
 0x4be   : > { %4510 = vmatprep.subr.bf16.mxu1 %v4764_v44 }
 0x57f   : > { %v1758_v57 = vpop.f32.mrb[6].mxu1 }
 0x580   : > { %v1832_v58 = vadd.f32 %v1831_v21, %v1758_v57  ;;  %v3996_v59 = vpop.f32.mrb[7].mxu1  ;;  %v3505_v21 = vld [vmem:[%s5896_s0 + $0xe8] sm:$0xff]  ;;  %v2436_v57 = vld [vmem:[%s5833_s15 + $0x30] sm:$0xff]  ;;  %s5898_s0 = sld [smem:[#allocation23_spill]] }
 0x581   : > { %v4529_v22 = vpack.c.bf16 %v3505_v21, %v3504_v19  ;;  %v3531_v21 = vld [vmem:[%s5833_s15 + $0xa8] sm:$0xff] }
 0x583   : > { %v1906_v63 = vpop.f32.mrb[8].mxu1 }
 0x584   : > { %v4020_v0 = vpop.f32.mrb[9].mxu1  ;;  %4038 = vmatmul.mubr.msk.f32.vlgmr.msra.gmra.mrb[10].mxu1 %vm894_vm1, %v1906_v63  ;;  %v3512_v63 = vld [vmem:[%s5833_s15 + $0x48] sm:$0xff] }
 0x585   : > { %4512 = vmatpush3.bf16.msra.mxu1 %v4511_v60  ;;  %4107 = vmatprep.mubr.msk.f32.mxu1 %vm4765_vm2, %v4766_v45 }
 0x586   : > { %4513 = vmatprep.subr.bf16.mxu1 %v4764_v44  ;;  %s5776_s9 = scalar_lea.hbm %s5898_s0, %s3570_s4 }
 0x589   : > { %4515 = vmatpush3.bf16.msra.mxu1 %v4514_v1 }
 0x58a   : > { %4516 = vmatprep.subr.bf16.mxu1 %v4764_v44 }
 0x58d   : > { %4518 = vmatpush3.bf16.msra.mxu1 %v4517_v4  ;;  %v4547_v4 = vpack.c.bf16 %v3512_v63, %v3511_v62  ;;  %v3544_v62 = vld [vmem:[%s5835_s17 + $0xb0] sm:$0xff]  ;;  %v3545_v63 = vld [vmem:[%s5835_s17 + $0xb8] sm:$0xff] }
 0x58e   : > { %4519 = vmatprep.subr.bf16.mxu1 %v4764_v44 }
 0x591   : > { %4521 = vmatpush3.bf16.msra.mxu1 %v4520_v7  ;;  %v4550_v7 = vpack.c.bf16 %v3514_v6, %v3513_v5  ;;  %v2777_v5 = vld [vmem:[%s5835_s17 + $0x58] sm:$0xff]  ;;  %v3548_v6 = vld [vmem:[%s5835_s17 + $0xd0] sm:$0xff] }
 0x592   : > { %4522 = vmatprep.subr.bf16.mxu1 %v4764_v44 }
 0x595   : > { %4524 = vmatpush3.bf16.msra.mxu1 %v4523_v10  ;;  %v4553_v10 = vpack.c.bf16 %v3516_v9, %v3515_v8  ;;  %v3549_v8 = vld [vmem:[%s5835_s17 + $0xd8] sm:$0xff] }
 0x596   : > { %4525 = vmatprep.subr.bf16.mxu1 %v4764_v44  ;;  %v4610_v9 = vpack.c.bf16 %v3549_v8, %v3548_v6 }
 0x599   : > { %4527 = vmatpush3.bf16.msra.mxu1 %v4526_v16  ;;  %v3528_v16 = vld [vmem:[%s5833_s15 + $0x90] sm:$0xff] }
 0x59a   : > { %4528 = vmatprep.subr.bf16.mxu1 %v4764_v44  ;;  %v4562_v19 = vpack.c.bf16 %v3529_v18, %v3528_v16  ;;  %v2780_v16 = vld [vmem:[%s5835_s17 + $0x70] sm:$0xff] }
 0x59b   : > { %v3552_v18 = vld [vmem:[%s5835_s17 + $0xf0] sm:$0xff] }
 0x59d   : > { %4530 = vmatpush3.bf16.msra.mxu1 %v4529_v22  ;;  %v4565_v22 = vpack.c.bf16 %v3531_v21, %v3530_v20  ;;  %v3553_v20 = vld [vmem:[%s5835_s17 + $0xf8] sm:$0xff] }
 0x59e   : > { %4531 = vmatprep.subr.bf16.mxu1 %v4764_v44  ;;  %v4616_v21 = vpack.c.bf16 %v3553_v20, %v3552_v18 }
 0x5a1   : > { %4533 = vmatpush3.bf16.msra.mxu1 %v4532_v28  ;;  %v3532_v28 = vld [vmem:[%s5833_s15 + $0xb0] sm:$0xff] }
 0x5a2   : > { %4534 = vmatprep.subr.bf16.mxu1 %v4764_v44 }
 0x657   : > { %v1988_v29 = vpop.f32.mrb[10].mxu1 }
 0x658   : > { %v1992_v31 = vadd.f32 %v1988_v29, %v1832_v58  ;;  %v4039_v32 = vpop.f32.mrb[11].mxu1  ;;  %v2437_v58 = vld [vmem:[%s5833_s15 + $0x38] sm:$0xff] }
 0x659   : > { %v4544_v59 = vpack.c.bf16 %v2437_v58, %v2436_v57  ;;  %v3533_v29 = vld [vmem:[%s5833_s15 + $0xb8] sm:$0xff]  ;;  %v2767_v32 = vld [vmem:[%s5835_s17 + $0x8] sm:$0xff]  ;;  %v4598_v58 = vpack.c.bf16 %v3541_v55, %v3540_v54 }
 0x65a   : > { %v2000_v33 = vadd.f32 %v3489_v30, %v1992_v31  ;;  %v4568_v30 = vpack.c.bf16 %v3533_v29, %v3532_v28  ;;  %v2766_v31 = vld [vmem:[%s5835_s17] sm:$0xff]  ;;  %v3562_v54 = vld [vmem:[%s5840_s22 + $0x58] sm:$0xff] }
 0x65b   : > { %v3537_v29 = vld [vmem:[%s5839_s21] ss:$0 sm:$0xff] }
 0x65c   : > { %v2001_v35 = vmax.f32 %v2000_v33, 0.0  ;;  %v4571_v33 = vpack.c.bf16 %v2767_v32, %v2766_v31  ;;  %v3093_v32 = vld [vmem:[%s5840_s22] sm:$0xff] }
 0x65e   : > { %v2009_v37 = vmul.f32 %v3490_v34, %v2001_v35  ;;  %v2768_v34 = vld [vmem:[%s5835_s17 + $0x10] sm:$0xff]  ;;  %v2769_v35 = vld [vmem:[%s5835_s17 + $0x18] sm:$0xff] }
 0x660   : > { %v2017_v38 = vadd.f32 %v3491_v36, %v2009_v37  ;;  %v4574_v36 = vpack.c.bf16 %v2769_v35, %v2768_v34  ;;  %v2770_v37 = vld [vmem:[%s5835_s17 + $0x20] sm:$0xff]  ;;  %v3095_v35 = vld [vmem:[%s5840_s22 + $0x10] sm:$0xff] }
 0x662   : > { %4073 = vmatmul.mubr.f32.vlgmr.msra.gmra.mrb[12].mxu0 %v2017_v38  ;;  %4108 = vmatmul.mubr.f32.vlgmr.msra.gmra.mrb[12].mxu1 %v2017_v38  ;;  %v2771_v38 = vld [vmem:[%s5835_s17 + $0x28] sm:$0xff] }
 0x663   : > { %4112 = vmatprep.mubr.msk.f32.mxu0 %vm4765_vm2, %v4766_v45  ;;  %4141 = vmatprep.mubr.msk.f32.mxu1 %vm4765_vm2, %v4766_v45 }
 0x664   : > { %4536 = vmatpush3.bf16.msra.mxu1 %v4535_v51 }
 0x665   : > { %4537 = vmatprep.subr.bf16.mxu1 %v4764_v44 }
 0x668   : > { %4539 = vmatpush3.bf16.msra.mxu1 %v4538_v53  ;;  %v4595_v53 = vpack.c.bf16 %v3539_v49, %v3538_v48  ;;  %v2940_v48 = vld [vmem:[%s5836_s18] sm:$0x3] }
 0x669   : > { %4540 = vmatprep.subr.bf16.mxu1 %v4764_v44  ;;  %v3559_v49 = vld [vmem:[%s5840_s22 + $0x40] sm:$0xff] }
 0x66c   : > { %4542 = vmatpush3.bf16.msra.mxu1 %v4541_v56 }
 0x66d   : > { %4543 = vmatprep.subr.bf16.mxu1 %v4764_v44 }
 0x670   : > { %4545 = vmatpush3.bf16.msra.mxu1 %v4544_v59  ;;  %v3542_v59 = vld [vmem:[%s5835_s17 + $0xa0] sm:$0xff] }
 0x671   : > { %4163 = vmatprep.subr.mxu1 %v4766_v45 }
 0x735   : > { %v2100_v39 = vpop.f32.mrb[12].mxu0  ;;  %v2187_v40 = vpop.f32.mrb[12].mxu1 }
 0x736   : > { %v2191_v41 = vmax.f32 %v2100_v39, %v2187_v40  ;;  %v4074_v42 = vpop.f32.mrb[13].mxu0  ;;  %v4109_v43 = vpop.f32.mrb[13].mxu1  ;;  %v4577_v39 = vpack.c.bf16 %v2771_v38, %v2770_v37  ;;  %v2772_v40 = vld [vmem:[%s5835_s17 + $0x30] sm:$0xff]  ;;  %v3097_v38 = vld [vmem:[%s5840_s22 + $0x20] sm:$0xff] }
 0x737   : > { %v2774_v43 = vld [vmem:[%s5835_s17 + $0x40] sm:$0xff] }
 0x738   : > { %4111 = vmatpush3.msra.mxu0 %v2191_v41 }
 0x739   : > { %4113 = vmatmul.mubr.msk.f32.vlgmr.msra.gmra.mrb[14].mxu0 %vm1607_vm3, %v2192_v46  ;;  %4115 = vmatprep.subr.mxu0 %v4766_v45  ;;  %v2775_v46 = vld [vmem:[%s5835_s17 + $0x48] sm:$0xff] }
 0x73a   : > { %4116 = vmatpush3.msra.mxu0 %v2191_v41  ;;  %4117 = vmatprep.mubr.msk.f32.mxu0 %vm4765_vm2, %v4766_v45  ;;  %v2773_v41 = vld [vmem:[%s5835_s17 + $0x38] sm:$0xff] }
 0x73b   : > { %4120 = vmatprep.subr.mxu0 %v4766_v45  ;;  %v4580_v42 = vpack.c.bf16 %v2773_v41, %v2772_v40 }
 0x73d   : > { %4118 = vmatmul.mubr.msk.f32.vlgmr.msra.gmra.mrb[16].mxu0 %vm1607_vm3, %v3509_v47  ;;  %v4583_v47 = vpack.c.bf16 %v2775_v46, %v2774_v43 }
 0x73e   : > { %4122 = vmatprep.mubr.msk.f32.mxu0 %vm4765_vm2, %v4766_v45 }
 0x80c   : > { %v2262_v60 = vpop.f32.mrb[14].mxu0 }
 0x80d   : > { %v4114_v61 = vpop.f32.mrb[15].mxu0 }
 0x810   : > { %v2337_v0 = vpop.f32.mrb[16].mxu0 }
 0x811   : > { %v2341_v1 = vmax.f32 %v2262_v60, %v2337_v0  ;;  %v4119_v2 = vpop.f32.mrb[17].mxu0  ;;  %v3543_v60 = vld [vmem:[%s5835_s17 + $0xa8] sm:$0xff]  ;;  %v4604_v0 = vpack.c.bf16 %v3545_v63, %v3544_v62  ;;  %v3565_v62 = vld [vmem:[%s5840_s22 + $0x70] sm:$0xff]  ;;  %v3566_v63 = vld [vmem:[%s5840_s22 + $0x78] sm:$0xff] }
 0x812   : > { %v4601_v61 = vpack.c.bf16 %v3543_v60, %v3542_v59  ;;  %v3547_v2 = vld [vmem:[%s5835_s17 + $0xc8] sm:$0xff]  ;;  %v3099_v59 = vld [vmem:[%s5840_s22 + $0x30] sm:$0xff]  ;;  %v3100_v60 = vld [vmem:[%s5840_s22 + $0x38] sm:$0xff] }
 0x813   : > { %4121 = vmatpush3.msk.msra.mxu0 %vm2356_vm4, %v2341_v1 }
 0x814   : > { %4123 = vmatmul.mubr.msk.f32.vlgmr.msra.gmra.mrb[18].mxu0 %vm2352_vm5, %v2351_v3  ;;  %4546 = vmatprep.subr.bf16.mxu0 %v4764_v44 }
 0x815   : > { %4548 = vmatpush3.bf16.msra.mxu0 %v4547_v4  ;;  %4160 = vmatprep.mubr.msk.f32.mxu0 %vm4765_vm2, %v4766_v45  ;;  %v2776_v4 = vld [vmem:[%s5835_s17 + $0x50] sm:$0xff] }
 0x816   : > { %4549 = vmatprep.subr.bf16.mxu0 %v4764_v44 }
 0x819   : > { %4551 = vmatpush3.bf16.msra.mxu0 %v4550_v7  ;;  %v4586_v7 = vpack.c.bf16 %v2777_v5, %v2776_v4  ;;  %v3260_v4 = vld [vmem:[%s5842_s24 + $0x8] sm:$0xff] }
 0x81a   : > { %4552 = vmatprep.subr.bf16.mxu0 %v4764_v44 }
 0x81d   : > { %4554 = vmatpush3.bf16.msra.mxu0 %v4553_v10  ;;  %v2778_v10 = vld [vmem:[%s5835_s17 + $0x60] sm:$0xff] }
 0x81e   : > { %4555 = vmatprep.subr.bf16.mxu0 %v4764_v44 }
 0x821   : > { %4557 = vmatpush3.bf16.msra.mxu0 %v4556_v13  ;;  %v4589_v13 = vpack.c.bf16 %v2779_v11, %v2778_v10  ;;  %v3261_v10 = vld [vmem:[%s5842_s24 + $0x10] sm:$0xff]  ;;  %v3262_v11 = vld [vmem:[%s5842_s24 + $0x18] sm:$0xff] }
 0x822   : > { %4558 = vmatprep.subr.bf16.mxu0 %v4764_v44  ;;  %v4646_v12 = vpack.c.bf16 %v3262_v11, %v3261_v10 }
 0x824   : > { %4161 = vmatmul.mubr.msk.f32.vlgmr.msra.gmra.mrb[20].mxu0 %vm894_vm1, %v2341_v1 }
 0x825   : > { %4184 = vmatprep.mubr.msk.f32.mxu0 %vm4765_vm2, %v4766_v45  ;;  %4560 = vmatpush3.bf16.msra.mxu0 %v4559_v17  ;;  %v2781_v17 = vld [vmem:[%s5835_s17 + $0x78] sm:$0xff] }
 0x826   : > { %4561 = vmatprep.subr.bf16.mxu0 %v4764_v44 }
 0x829   : > { %4563 = vmatpush3.bf16.msra.mxu0 %v4562_v19  ;;  %v4592_v19 = vpack.c.bf16 %v2781_v17, %v2780_v16  ;;  %v3266_v16 = vld [vmem:[%s5842_s24 + $0x38] sm:$0xff] }
 0x82a   : > { %4564 = vmatprep.subr.bf16.mxu0 %v4764_v44 }
 0x82d   : > { %4566 = vmatpush3.bf16.msra.mxu0 %v4565_v22 }
 0x82e   : > { %4567 = vmatprep.subr.bf16.mxu0 %v4764_v44 }
 0x831   : > { %4569 = vmatpush3.bf16.msra.mxu0 %v4568_v30 }
 0x832   : > { %4594 = vmatprep.subr.bf16.mxu0 %v4764_v44 }
 0x8e7   : > { %v2426_v23 = vpop.f32.mrb[18].mxu0 }
 0x8e8   : > { %v4124_v24 = vpop.f32.mrb[19].mxu0  ;;  %4142 = vmatmul.mubr.msk.f32.vlgmr.msra.gmra.mrb[14].mxu1 %vm894_vm1, %v2426_v23  ;;  %v3535_v23 = vld [vmem:[%s5837_s19] ss:$0 sm:$0xff] }
 0x8e9   : > { %4164 = vmatpush3.msk.msra.mxu1 %vm2356_vm4, %v2341_v1  ;;  %4165 = vmatprep.mubr.msk.f32.mxu1 %vm4765_vm2, %v4766_v45  ;;  %v3546_v1 = vld [vmem:[%s5835_s17 + $0xc0] sm:$0xff] }
 0x8ea   : > { %4570 = vmatprep.subr.bf16.mxu1 %v4764_v44  ;;  %v4607_v3 = vpack.c.bf16 %v3547_v2, %v3546_v1 }
 0x8ec   : > { %4166 = vmatmul.mubr.msk.f32.vlgmr.msra.gmra.mrb[16].mxu1 %vm2352_vm5, %v3523_v25 }
 0x8ed   : > { %4219 = vmatprep.mubr.msk.f32.mxu1 %vm4765_vm2, %v4766_v45  ;;  %4572 = vmatpush3.bf16.msra.mxu1 %v4571_v33  ;;  %v3094_v33 = vld [vmem:[%s5840_s22 + $0x8] sm:$0xff] }
 0x8ee   : > { %4573 = vmatprep.subr.bf16.mxu1 %v4764_v44  ;;  %v4631_v34 = vpack.c.bf16 %v3094_v33, %v3093_v32 }
 0x8f1   : > { %4575 = vmatpush3.bf16.msra.mxu1 %v4574_v36  ;;  %v3096_v36 = vld [vmem:[%s5840_s22 + $0x18] sm:$0xff] }
 0x8f2   : > { %4576 = vmatprep.subr.bf16.mxu1 %v4764_v44  ;;  %v4634_v37 = vpack.c.bf16 %v3096_v36, %v3095_v35 }
 0x8f5   : > { %4578 = vmatpush3.bf16.msra.mxu1 %v4577_v39  ;;  %v3098_v39 = vld [vmem:[%s5840_s22 + $0x28] sm:$0xff] }
 0x8f6   : > { %4579 = vmatprep.subr.bf16.mxu1 %v4764_v44  ;;  %v4637_v40 = vpack.c.bf16 %v3098_v39, %v3097_v38 }
 0x8f7   : > { %v2579_v26 = vpop.f32.mrb[20].mxu0 }
 0x8f8   : > { %v4162_v27 = vpop.f32.mrb[21].mxu0 }
 0x8f9   : > { %4581 = vmatpush3.bf16.msra.mxu1 %v4580_v42  ;;  %v3536_v27 = vld [vmem:[%s5838_s20] ss:$0 sm:$0xff] }
 0x8fa   : > { %4582 = vmatprep.subr.bf16.mxu1 %v4764_v44 }
 0x8fd   : > { %4584 = vmatpush3.bf16.msra.mxu1 %v4583_v47 }
 0x8fe   : > { %4585 = vmatprep.subr.bf16.mxu1 %v4764_v44 }
 0x901   : > { %4587 = vmatpush3.bf16.msra.mxu1 %v4586_v7 }
 0x902   : > { %4588 = vmatprep.subr.bf16.mxu1 %v4764_v44 }
 0x905   : > { %4590 = vmatpush3.bf16.msra.mxu1 %v4589_v13  ;;  %v3263_v13 = vld [vmem:[%s5842_s24 + $0x20] sm:$0xff] }
 0x906   : > { %4591 = vmatprep.subr.bf16.mxu1 %v4764_v44 }
 0x909   : > { %4593 = vmatpush3.bf16.msra.mxu1 %v4592_v19 }
 0x90a   : > { %4257 = vmatprep.subr.mxu1 %v4766_v45 }
 0x9bb   : > { %v2507_v50 = vpop.f32.mrb[14].mxu1 }
 0x9bc   : > { %v2580_v51 = vadd.f32 %v2579_v26, %v2507_v50  ;;  %v4143_v52 = vpop.f32.mrb[15].mxu1  ;;  %v3560_v50 = vld [vmem:[%s5840_s22 + $0x48] sm:$0xff] }
 0x9bd   : > { %v4619_v52 = vpack.c.bf16 %v3560_v50, %v3559_v49 }
 0x9bf   : > { %v2654_v56 = vpop.f32.mrb[16].mxu1 }
 0x9c0   : > { %v4167_v57 = vpop.f32.mrb[17].mxu1  ;;  %4185 = vmatmul.mubr.msk.f32.vlgmr.msra.gmra.mrb[22].mxu0 %vm894_vm1, %v2654_v56  ;;  %v3563_v56 = vld [vmem:[%s5840_s22 + $0x60] sm:$0xff] }
 0x9c1   : > { %4596 = vmatpush3.bf16.msra.mxu0 %v4595_v53  ;;  %4254 = vmatprep.mubr.msk.f32.mxu0 %vm4765_vm2, %v4766_v45  ;;  %v3561_v53 = vld [vmem:[%s5840_s22 + $0x50] sm:$0xff]  ;;  %v3564_v57 = vld [vmem:[%s5840_s22 + $0x68] sm:$0xff] }
 0x9c2   : > { %4597 = vmatprep.subr.bf16.mxu0 %v4764_v44  ;;  %v4622_v55 = vpack.c.bf16 %v3562_v54, %v3561_v53 }
 0x9c5   : > { %4599 = vmatpush3.bf16.msra.mxu0 %v4598_v58  ;;  %v4625_v58 = vpack.c.bf16 %v3564_v57, %v3563_v56 }
 0x9c6   : > { %4600 = vmatprep.subr.bf16.mxu0 %v4764_v44 }
 0x9c9   : > { %4602 = vmatpush3.bf16.msra.mxu0 %v4601_v61  ;;  %v4640_v61 = vpack.c.bf16 %v3100_v60, %v3099_v59 }
 0x9ca   : > { %4603 = vmatprep.subr.bf16.mxu0 %v4764_v44 }
 0x9cd   : > { %4605 = vmatpush3.bf16.msra.mxu0 %v4604_v0  ;;  %v4628_v0 = vpack.c.bf16 %v3566_v63, %v3565_v62 }
 0x9ce   : > { %4606 = vmatprep.subr.bf16.mxu0 %v4764_v44 }
 0x9d1   : > { %4608 = vmatpush3.bf16.msra.mxu0 %v4607_v3  ;;  %v3259_v3 = vld [vmem:[%s5842_s24] sm:$0xff] }
 0x9d2   : > { %4609 = vmatprep.subr.bf16.mxu0 %v4764_v44  ;;  %v4643_v8 = vpack.c.bf16 %v3260_v4, %v3259_v3 }
 0x9d5   : > { %4611 = vmatpush3.bf16.msra.mxu0 %v4610_v9 }
 0x9d6   : > { %4612 = vmatprep.subr.bf16.mxu0 %v4764_v44 }
 0x9d9   : > { %4614 = vmatpush3.bf16.msra.mxu0 %v4613_v15  ;;  %v4649_v15 = vpack.c.bf16 %v3264_v14, %v3263_v13 }
 0x9da   : > { %4615 = vmatprep.subr.bf16.mxu0 %v4764_v44 }
 0x9dd   : > { %4617 = vmatpush3.bf16.msra.mxu0 %v4616_v21  ;;  %v3256_v21 = vld [vmem:[%s5841_s23] sm:$0x1] }
 0x9de   : > { %4630 = vmatprep.subr.bf16.mxu0 %v4764_v44 }
 0xa93   : > { %v2736_v22 = vpop.f32.mrb[22].mxu0 }
 0xa94   : > { %v2740_v24 = vadd.f32 %v2736_v22, %v2580_v51  ;;  %v4186_v25 = vpop.f32.mrb[23].mxu0  ;;  %v3556_v51 = vld [vmem:[%s5836_s18 + $0x2] sm:$0x3] }
 0xa95   : > { %v3267_v25 = vld [vmem:[%s5897_s1] sm:$0x1]  ;;  %s4704_s1 = sshll.u32 %s4767_s8, 4  ;;  %s4705_s1 = int_to_ptr.vmem [resolvable:$false] %s4704_s1 }
 0xa96   : > { %v2748_v26 = vadd.f32 %v3535_v23, %v2740_v24  ;;  %s4706_s10 = scalar_lea.vmem %s4705_s1, 32  ;;  %p4707_p0 = scmp.lt.s32.totalorder %s5778_s7, %s4705_s1 }
 0xa97   : > { %p4708_p1 = scmp.lt.s32.totalorder %s4706_s10, %s4700_s26 }
 0xa98   : > { %v2749_v28 = vmax.f32 %v2748_v26, 0.0 }
 0xa99   : > { %p4709_p2 = por %p4708_p1, %p4707_p0 }
 0xa9a   : > { %v2757_v30 = vmul.f32 %v3536_v27, %v2749_v28 }
 0xa9b   : > { %p4710_p3 = pnand %p4709_p2, %p4703_p13 }
 0xa9c   : > { %v2765_v31 = vadd.f32 %v3537_v29, %v2757_v30 }
 0xa9e   : > { %4220 = vmatmul.mubr.f32.vlgmr.msra.gmra.mrb[18].mxu1 %v2765_v31  ;;  %4255 = vmatmul.mubr.f32.vlgmr.msra.gmra.mrb[24].mxu0 %v2765_v31 }
 0xa9f   : > { %4259 = vmatprep.mubr.msk.f32.mxu1 %vm4765_vm2, %v4766_v45  ;;  %4302 = vmatprep.mubr.msk.f32.mxu0 %vm4765_vm2, %v4766_v45 }
 0xaa0   : > { %4632 = vmatpush3.bf16.msra.mxu0 %v4631_v34 }
 0xaa1   : > { %4633 = vmatprep.subr.bf16.mxu0 %v4764_v44 }
 0xaa4   : > { %4635 = vmatpush3.bf16.msra.mxu0 %v4634_v37 }
 0xaa5   : > { %4636 = vmatprep.subr.bf16.mxu0 %v4764_v44 }
 0xaa8   : > { %4638 = vmatpush3.bf16.msra.mxu0 %v4637_v40 }
 0xaa9   : > { %4639 = vmatprep.subr.bf16.mxu0 %v4764_v44 }
 0xaac   : > { %4641 = vmatpush3.bf16.msra.mxu0 %v4640_v61 }
 0xb71   : > { %v2848_v41 = vpop.f32.mrb[18].mxu1  ;;  %v2935_v42 = vpop.f32.mrb[24].mxu0 }
 0xb72   : > { %v2939_v43 = vmax.f32 %v2848_v41, %v2935_v42  ;;  %v4221_v46 = vpop.f32.mrb[19].mxu1  ;;  %v4256_v47 = vpop.f32.mrb[25].mxu0 }
 0xb74   : > { %4258 = vmatpush3.msk.msra.mxu1 %vm2356_vm4, %v2939_v43 }
 0xb75   : > { %4260 = vmatmul.mubr.msk.f32.vlgmr.msra.gmra.mrb[20].mxu1 %vm2352_vm5, %v2940_v48  ;;  %4262 = vmatprep.subr.mxu1 %v4766_v45 }
 0xb76   : > { %4263 = vmatpush3.msk.msra.mxu1 %vm2356_vm4, %v2939_v43  ;;  %4264 = vmatprep.mubr.msk.f32.mxu1 %vm4765_vm2, %v4766_v45 }
 0xb77   : > { %4618 = vmatprep.subr.bf16.mxu1 %v4764_v44 }
 0xb79   : > { %4265 = vmatmul.mubr.msk.f32.vlgmr.msra.gmra.mrb[22].mxu1 %vm2352_vm5, %v3556_v51 }
 0xb7a   : > { %4620 = vmatpush3.bf16.msra.mxu1 %v4619_v52  ;;  %4283 = vmatprep.mubr.msk.f32.mxu1 %vm4765_vm2, %v4766_v45 }
 0xb7b   : > { %4621 = vmatprep.subr.bf16.mxu1 %v4764_v44 }
 0xb7e   : > { %4623 = vmatpush3.bf16.msra.mxu1 %v4622_v55 }
 0xb7f   : > { %4624 = vmatprep.subr.bf16.mxu1 %v4764_v44 }
 0xb82   : > { %4626 = vmatpush3.bf16.msra.mxu1 %v4625_v58 }
 0xb83   : > { %4627 = vmatprep.subr.bf16.mxu1 %v4764_v44 }
 0xb86   : > { %4629 = vmatpush3.bf16.msra.mxu1 %v4628_v0 }
 0xb87   : > { %4642 = vmatprep.subr.bf16.mxu1 %v4764_v44 }
 0xc48   : > { %v3013_v1 = vpop.f32.mrb[20].mxu1 }
 0xc49   : > { %v4261_v2 = vpop.f32.mrb[21].mxu1 }
 0xc4c   : > { %v3088_v5 = vpop.f32.mrb[22].mxu1 }
 0xc4d   : > { %v3092_v6 = vmax.f32 %v3013_v1, %v3088_v5  ;;  %v4266_v7 = vpop.f32.mrb[23].mxu1 }
 0xc4f   : > { %v3111_v9 = vrot.slane %v3092_v6, 1  ;;  %4303 = vmatmul.mubr.msk.f32.vlgmr.msra.gmra.mrb[26].mxu0 %vm894_vm1, %v3092_v6 }
 0xc51   : > { %4284 = vmatmul.mubr.msk.f32.vlgmr.msra.gmra.mrb[24].mxu1 %vm894_vm1, %v3111_v9 }
 0xc52   : > { %4644 = vmatpush3.bf16.msra.mxu1 %v4643_v8  ;;  %4321 = vmatprep.mubr.msk.f32.mxu1 %vm4765_vm2, %v4766_v45  ;;  %v3265_v45 = vld [vmem:[%s5842_s24 + $0x30] sm:$0xff] }
 0xc53   : > { %4645 = vmatprep.subr.bf16.mxu1 %v4764_v44  ;;  %v4652_v17 = vpack.c.bf16 %v3266_v16, %v3265_v45 }
 0xc56   : > { %4647 = vmatpush3.bf16.msra.mxu1 %v4646_v12 }
 0xc57   : > { %4648 = vmatprep.subr.bf16.mxu1 %v4764_v44 }
 0xc5a   : > { %4650 = vmatpush3.bf16.msra.mxu1 %v4649_v15 }
 0xc5b   : > { %4651 = vmatprep.subr.bf16.mxu1 %v4764_v44 }
 0xc5e   : > { %4653 = vmatpush3.bf16.msra.mxu1 %v4652_v17 }
 0xd22   : > { %v3252_v18 = vpop.f32.mrb[26].mxu0 }
 0xd23   : > { %v4304_v19 = vpop.f32.mrb[27].mxu0 }
 0xd24   : > { %v3180_v20 = vpop.f32.mrb[24].mxu1 }
 0xd25   : > { %v3253_v22 = vadd.f32 %v3252_v18, %v3180_v20  ;;  %v4285_v44 = vpop.f32.mrb[25].mxu1 }
 0xd27   : > { %v3257_v23 = vadd.f32 %v3256_v21, %v3253_v22 }
 0xd29   : > { %v3258_v24 = vmax.f32 %v3257_v23, 0.0 }
 0xd2b   : > { %4322 = vmatmul.mubr.msk.f32.vlgmr.msra.gmra.mrb[26].mxu1 %vm894_vm1, %v3258_v24 }
 0xdfe   : > { %v3337_v26 = vpop.f32.mrb[26].mxu1 }
 0xdff   : > { %v3338_v27 = vadd.f32 %v3337_v26, %v3267_v25  ;;  %v4323_v28 = vpop.f32.mrb[27].mxu1 }
 0xe01   : > { %v3341_v29 = vmax.f32 %v3338_v27, 0.0 }
 0xe03   : > { %3342 = vst [vmem:[%s784_s6] sm:$0x1] %v3341_v29 }
 0xe04   : > { %4713 = shalt.err (!%p4710_p3)
}
 0xe05   : > { %s4714_s5 = scalar_lea.hbm %s5776_s9, 16  ;;  %s4718_s29 = scalar_lea.hbm %s5898_s0, 32 }
 0xe06   : > { %p4715_p4 = scmp.ne.s32.totalorder %s5776_s9, %s4714_s5  ;;  %p4719_p9 = scmp.lt.u32.totalorder %s5776_s9, %s5898_s0 }
 0xe07   : > { %p4720_p10 = scmp.lt.u32.totalorder %s4718_s29, %s4714_s5  ;;  %p4722_p12 = scmp.lt.u32.totalorder %s4714_s5, %s5776_s9 }
 0xe08   : > { %p4716_p7 = pnand %p4715_p4, %p4941_p5 }
 0xe09   : > { %p4721_p11 = por %p4720_p10, %p4719_p9 }
 0xe0a   : > { %p4717_p8 = pneg %p4716_p7 }
 0xe0b   : > { %p4723_p13 = por %p4722_p12, %p4721_p11 }
 0xe0d   : > { %p4724_p0 = pnand %p4723_p13, %p4717_p8 }
 0xe0f   : > { %4727 = shalt.err (!%p4724_p0)
}
 0xe10   : > { %4658 = dma.vmem_to_hbm [thread:$0]  (%p4941_p5), %s5778_s7, 16, %s5776_s9, %s3344_s28  }
 0xe11 PF: > { %s5899_s10 = sld [smem:[#allocation7_spill]]  ;;  %s5900_s26 = sld [smem:[#allocation5_spill]] }
 0xe17   : > { %p4664_p1 = scmp.ge.s32.totalorder %s5899_s10, 2  ;;  %s3368_s4 = sand.u32 1, %s5900_s26  }
 0xe18   : > { %s3369_s6 = scalar_lea.sflag [#allocation3], %s3368_s4 }
 0xe19   : > { %p4661_p2 = pnand %p4664_p1, %p4945_p6 }
 0xe1b   : > { %4745 = dma.done.wait (!%p4661_p2), %s3369_s6, 16  }
 0xe1c   : > { %4747 = vsyncadd (!%p4661_p2), %s3369_s6, 4294967280  ;;  %s5902_s28 = sld [smem:[#allocation8_spill]]  ;;  %s5903_s5 = sld [smem:[#allocation6_spill]] }
 0xe1d   : > { %s5904_s7 = sld [smem:[#allocation9_spill]]  ;;  %s5905_s27 = smov %s4754_s3 }
 0xe22   : > { %p36_p3 = scmp.ge.s32.totalorder %s5902_s28, 4   ;;  %s5906_s3 = smov %s5903_s5 }
 0xe24   :  { %38 = sbr.rel (!%p36_p3) target bundleno = 17 (0x11), region = 175 }
 0xe2b   :  { %3373 = vsyncpa [#allocation3], 1 }
 0xe2c   :  { %3375 = vsyncpa [#allocation3 + $0x1], 1 }

</bundles_post_ra>
